<compile_context>
chip_gen: v7x
topology: tpu7x:2x2x1
jax: 0.10.0
libtpu: 0.0.40
codegen_flags: <defaults>
</compile_context>

<pallas_src>
import math

import jax
import jax.numpy as jnp
import numpy as np
from jax.experimental import pallas as pl
from jax.experimental.pallas import tpu as pltpu

LN_EPS = 1e-5
INV_SQRT2 = 0.7071067811865476
_VMEM_LIMIT_BYTES = 64 * 1024 * 1024


def _pick_time_block(T, cap=32):
    """Largest divisor of T that is a multiple of 8 and <= cap; fall back to T."""
    for c in range(min(cap, T), 0, -1):
        if T % c == 0 and c % 8 == 0:
            return c
    return T


# --------------------------------------------------------------------------------------
# Stage 1: LayerNorm -> GELU -> input projection for both directions and all three gates.
# Parallel over time blocks; all matmuls are (Tc, D) x (D, H) on the MXU.
# --------------------------------------------------------------------------------------
def _input_proj_kernel(x_ref, ln_w_ref, ln_b_ref, wih_ref, bih_ref, gi_ref):
    B = x_ref.shape[0]
    n_dir, n_gate = wih_ref.shape[0], wih_ref.shape[1]
    ln_w = ln_w_ref[...]   # (1, D)
    ln_b = ln_b_ref[...]   # (1, D)
    for b in range(B):
        xb = x_ref[b].astype(jnp.float32)                         # (Tc, D)
        mu = jnp.mean(xb, axis=-1, keepdims=True)
        var = jnp.mean(jnp.square(xb - mu), axis=-1, keepdims=True)
        xn = (xb - mu) * jax.lax.rsqrt(var + LN_EPS)
        xn = xn * ln_w + ln_b
        a = 0.5 * xn * (1.0 + jax.lax.erf(xn * INV_SQRT2))        # exact GELU (F.gelu default)
        for d in range(n_dir):
            for g in range(n_gate):
                y = jnp.dot(a, wih_ref[d, g],
                            preferred_element_type=jnp.float32) + bih_ref[d, g]   # (Tc, H)
                gi_ref[d, g, :, b, :] = y


# --------------------------------------------------------------------------------------
# Stage 2: the GRU recurrence. grid = (direction, time-block); the hidden state lives in
# VMEM scratch and is carried across the (sequential) time-block axis.
# --------------------------------------------------------------------------------------
def _recurrence_kernel(gi_ref, whh_ref, bhh_ref, out_ref, h_scr, y_scr):
    d = pl.program_id(0)      # 0 = forward, 1 = backward
    tb = pl.program_id(1)
    tc, B, H = y_scr.shape

    @pl.when(tb == 0)
    def _():
        h_scr[...] = jnp.zeros_like(h_scr)

    def step_fn(tt, carry):
        # forward walks the block 0..tc-1, backward walks it tc-1..0
        step = tt + d * (tc - 1 - 2 * tt)
        h = h_scr[...]                                            # (B, H)
        gr = gi_ref[0, step] + jnp.dot(h, whh_ref[0],
                                       preferred_element_type=jnp.float32) + bhh_ref[0]
        gz = gi_ref[1, step] + jnp.dot(h, whh_ref[1],
                                       preferred_element_type=jnp.float32) + bhh_ref[1]
        gn_h = jnp.dot(h, whh_ref[2],
                       preferred_element_type=jnp.float32) + bhh_ref[2]
        r = jax.nn.sigmoid(gr)
        z = jax.nn.sigmoid(gz)
        n = jnp.tanh(gi_ref[2, step] + r * gn_h)
        h_new = (1.0 - z) * n + z * h
        h_scr[...] = h_new
        y_scr[step] = h_new
        return carry

    jax.lax.fori_loop(0, tc, step_fn, 0, unroll=bool(tc <= 32))

    # One lane-dense (Tc, H) writeback per batch row into the batch-first output block.
    for b in range(B):
        out_ref[b] = y_scr[:, b, :].astype(out_ref.dtype)


def birnn_forward(x, params, *, time_block=32):
    """x: (B, T, D) float32 (batch_first, like the PyTorch module). Returns (B, T, 2*H)."""
    B, T, D = x.shape
    H = params["whh"].shape[-1]
    Tc = _pick_time_block(T, cap=time_block)
    nblk = T // Tc

    # ---------------- stage 1: precomputed gate projections gi (2, 3, T, B, H) ----------
    gi = pl.pallas_call(
        _input_proj_kernel,
        out_shape=jax.ShapeDtypeStruct((2, 3, T, B, H), jnp.float32),
        grid_spec=pltpu.PrefetchScalarGridSpec(
            num_scalar_prefetch=0,
            grid=(nblk,),
            in_specs=[
                pl.BlockSpec((B, Tc, D), lambda tb: (0, tb, 0)),       # x, read once
                pl.BlockSpec((1, D), lambda tb: (0, 0)),               # ln weight
                pl.BlockSpec((1, D), lambda tb: (0, 0)),               # ln bias
                pl.BlockSpec((2, 3, D, H), lambda tb: (0, 0, 0, 0)),   # W_ih (resident)
                pl.BlockSpec((2, 3, 1, H), lambda tb: (0, 0, 0, 0)),   # b_ih
            ],
            out_specs=pl.BlockSpec((2, 3, Tc, B, H), lambda tb: (0, 0, tb, 0, 0)),
        ),
        compiler_params=pltpu.CompilerParams(
            dimension_semantics=("parallel",),
            vmem_limit_bytes=_VMEM_LIMIT_BYTES,
        ),
    )(x, params["ln_w"], params["ln_b"], params["wih"], params["bih"])

    # ---------------- stage 2: sequential recurrence, one direction per grid row --------
    def t_act(d, tb):  # forward: tb ; backward: nblk-1-tb
        return tb + d * (nblk - 1 - 2 * tb)

    if H % 128 == 0:
        # lane-aligned: write straight into the final (B, T, 2H) layout (fwd = cols 0:H,
        # bwd = cols H:2H), zero epilogue.
        out_shape = jax.ShapeDtypeStruct((B, T, 2 * H), jnp.float32)
        out_spec = pl.BlockSpec((B, Tc, H), lambda d, tb: (0, t_act(d, tb), d))
        post = lambda o: o
    else:
        # fall back to a direction-major output + one cheap transpose outside the kernel.
        out_shape = jax.ShapeDtypeStruct((2, B, T, H), jnp.float32)
        out_spec = pl.BlockSpec((None, B, Tc, H), lambda d, tb: (d, 0, t_act(d, tb), 0))
        post = lambda o: jnp.transpose(o, (1, 2, 0, 3)).reshape(B, T, 2 * H)

    out = pl.pallas_call(
        _recurrence_kernel,
        out_shape=out_shape,
        grid_spec=pltpu.PrefetchScalarGridSpec(
            num_scalar_prefetch=0,
            grid=(2, nblk),
            in_specs=[
                pl.BlockSpec((None, 3, Tc, B, H),
                             lambda d, tb: (d, 0, t_act(d, tb), 0, 0)),    # gi for this dir
                pl.BlockSpec((None, 3, H, H), lambda d, tb: (d, 0, 0, 0)),  # W_hh (resident per dir)
                pl.BlockSpec((None, 3, 1, H), lambda d, tb: (d, 0, 0, 0)),  # b_hh
            ],
            out_specs=out_spec,
            scratch_shapes=[
                pltpu.VMEM((B, H), jnp.float32),        # hidden state carry
                pltpu.VMEM((Tc, B, H), jnp.float32),    # per-block output staging
            ],
        ),
        compiler_params=pltpu.CompilerParams(
            dimension_semantics=("parallel", "arbitrary"),   # dir axis -> 2 TCs on v7x
            vmem_limit_bytes=_VMEM_LIMIT_BYTES,
        ),
    )(gi, params["whh"], params["bhh"])

    return post(out)


def init_params(key, rnn_dim, hidden_size):
    """GRU weights U(-1/sqrt(H), 1/sqrt(H)) like PyTorch, stored per (direction, gate)
    with gate order [r, z, n], pre-transposed for `x @ W` / `h @ W`."""
    D, H = rnn_dim, hidden_size
    bound = 1.0 / math.sqrt(H)
    ks = jax.random.split(key, 6)
    u = lambda k, shape: jax.random.uniform(k, shape, jnp.float32, -bound, bound)
    return {
        # PyTorch default LN init is weight=1 / bias=0; small perturbation keeps the
        # numerical check meaningful without changing the forward semantics.
        "ln_w": 1.0 + 0.1 * jax.random.normal(ks[0], (1, D), jnp.float32),
        "ln_b": 0.1 * jax.random.normal(ks[1], (1, D), jnp.float32),
        "wih": u(ks[2], (2, 3, D, H)),
        "whh": u(ks[3], (2, 3, H, H)),
        "bih": u(ks[4], (2, 3, 1, H)),
        "bhh": u(ks[5], (2, 3, 1, H)),
    }


def birnn_reference(x, params):
    """Pure-JAX reference mirroring the PyTorch forward (eval mode)."""
    B, T, D = x.shape
    H = params["whh"].shape[-1]
    mu = jnp.mean(x, axis=-1, keepdims=True)
    var = jnp.mean((x - mu) ** 2, axis=-1, keepdims=True)
    xn = (x - mu) / jnp.sqrt(var + LN_EPS) * params["ln_w"][0] + params["ln_b"][0]
    a = 0.5 * xn * (1.0 + jax.lax.erf(xn * INV_SQRT2))          # (B, T, D)

    wih, bih = params["wih"], params["bih"]
    whh, bhh = params["whh"], params["bhh"]

    def run_dir(d, xs):  # xs: (T, B, D) in processing order
        def step(h, xt):
            r = jax.nn.sigmoid(xt @ wih[d, 0] + bih[d, 0] + h @ whh[d, 0] + bhh[d, 0])
            z = jax.nn.sigmoid(xt @ wih[d, 1] + bih[d, 1] + h @ whh[d, 1] + bhh[d, 1])
            n = jnp.tanh(xt @ wih[d, 2] + bih[d, 2] + r * (h @ whh[d, 2] + bhh[d, 2]))
            hn = (1.0 - z) * n + z * h
            return hn, hn
        _, ys = jax.lax.scan(step, jnp.zeros((B, H), jnp.float32), xs)
        return ys

    xs = jnp.transpose(a, (1, 0, 2))
    yf = run_dir(0, xs)
    yb = run_dir(1, xs[::-1])[::-1]
    return jnp.transpose(jnp.concatenate([yf, yb], axis=-1), (1, 0, 2))


if __name__ == "__main__":
    B, T, D, H = 2, 8, 32, 32
    key = jax.random.PRNGKey(0)
    kx, kp = jax.random.split(key)
    x = jax.random.normal(kx, (B, T, D), jnp.float32)
    params = init_params(kp, D, H)

    out = jax.block_until_ready(birnn_forward(x, params))
    assert out.shape == (B, T, 2 * H), out.shape

    ref = jax.block_until_ready(birnn_reference(x, params))
    if not np.allclose(np.asarray(out), np.asarray(ref), atol=1e-4, rtol=1e-4):
        raise AssertionError("Pallas kernel output does not match JAX reference")

    print("KERNEL_OK")
</pallas_src>

<mosaic_0001>
module attributes {stable_mosaic.version = 11 : i64} {
  func.func @_input_proj_kernel(%arg0: i32, %arg1: memref<2x8x32xf32, #tpu.memory_space<vmem>>, %arg2: memref<1x32xf32, #tpu.memory_space<vmem>>, %arg3: memref<1x32xf32, #tpu.memory_space<vmem>>, %arg4: memref<2x3x32x32xf32, #tpu.memory_space<vmem>>, %arg5: memref<2x3x1x32xf32, #tpu.memory_space<vmem>>, %arg6: memref<2x3x8x2x32xf32, #tpu.memory_space<vmem>>) attributes {dimension_semantics = [#tpu.dimension_semantics<parallel>], iteration_bounds = array<i64: 1>, scalar_prefetch = 0 : i64, scratch_operands = 0 : i64, tpu.core_type = #tpu.core_type<tc>, window_params = [{transform_indices = @transform_0, window_bounds = array<i64: 2, 8, 32>}, {pipeline_mode = #tpu.pipeline_mode<synchronous>, transform_indices = @transform_1, window_bounds = array<i64: 1, 32>}, {pipeline_mode = #tpu.pipeline_mode<synchronous>, transform_indices = @transform_2, window_bounds = array<i64: 1, 32>}, {pipeline_mode = #tpu.pipeline_mode<synchronous>, transform_indices = @transform_3, window_bounds = array<i64: 2, 3, 32, 32>}, {pipeline_mode = #tpu.pipeline_mode<synchronous>, transform_indices = @transform_4, window_bounds = array<i64: 2, 3, 1, 32>}, {transform_indices = @transform_5, window_bounds = array<i64: 2, 3, 8, 2, 32>}]} {
    %c0 = arith.constant 0 : index
    %c0_0 = arith.constant 0 : index
    %0 = vector.load %arg2[%c0, %c0_0] : memref<1x32xf32, #tpu.memory_space<vmem>>, vector<1x32xf32>
    %c0_1 = arith.constant 0 : index
    %c0_2 = arith.constant 0 : index
    %1 = vector.load %arg3[%c0_1, %c0_2] : memref<1x32xf32, #tpu.memory_space<vmem>>, vector<1x32xf32>
    %c0_3 = arith.constant 0 : index
    %c0_4 = arith.constant 0 : index
    %c0_5 = arith.constant 0 : index
    %2 = vector.load %arg1[%c0_3, %c0_4, %c0_5] : memref<2x8x32xf32, #tpu.memory_space<vmem>>, vector<1x8x32xf32>
    %3 = vector.shape_cast %2 : vector<1x8x32xf32> to vector<8x32xf32>
    %cst = arith.constant dense<0.000000e+00> : vector<8xf32>
    %4 = vector.multi_reduction <add>, %3, %cst [1] : vector<8x32xf32> to vector<8xf32>
    %5 = vector.shape_cast %4 : vector<8xf32> to vector<8x1xf32>
    %cst_6 = arith.constant 3.200000e+01 : f32
    %6 = vector.broadcast %cst_6 : f32 to vector<8x1xf32>
    %7 = arith.divf %5, %6 : vector<8x1xf32>
    %8 = vector.broadcast %7 : vector<8x1xf32> to vector<8x32xf32>
    %9 = arith.subf %3, %8 : vector<8x32xf32>
    %10 = arith.mulf %9, %9 : vector<8x32xf32>
    %cst_7 = arith.constant dense<0.000000e+00> : vector<8xf32>
    %11 = vector.multi_reduction <add>, %10, %cst_7 [1] : vector<8x32xf32> to vector<8xf32>
    %12 = vector.shape_cast %11 : vector<8xf32> to vector<8x1xf32>
    %cst_8 = arith.constant 3.200000e+01 : f32
    %13 = vector.broadcast %cst_8 : f32 to vector<8x1xf32>
    %14 = arith.divf %12, %13 : vector<8x1xf32>
    %15 = vector.broadcast %7 : vector<8x1xf32> to vector<8x32xf32>
    %16 = arith.subf %3, %15 : vector<8x32xf32>
    %cst_9 = arith.constant 9.99999974E-6 : f32
    %17 = vector.broadcast %cst_9 : f32 to vector<8x1xf32>
    %18 = arith.addf %14, %17 : vector<8x1xf32>
    %19 = math.rsqrt %18 : vector<8x1xf32>
    %20 = vector.broadcast %19 : vector<8x1xf32> to vector<8x32xf32>
    %21 = arith.mulf %16, %20 : vector<8x32xf32>
    %22 = vector.broadcast %0 : vector<1x32xf32> to vector<8x32xf32>
    %23 = arith.mulf %21, %22 : vector<8x32xf32>
    %24 = vector.broadcast %1 : vector<1x32xf32> to vector<8x32xf32>
    %25 = arith.addf %23, %24 : vector<8x32xf32>
    %cst_10 = arith.constant 5.000000e-01 : f32
    %26 = vector.broadcast %cst_10 : f32 to vector<8x32xf32>
    %27 = arith.mulf %26, %25 : vector<8x32xf32>
    %cst_11 = arith.constant 0.707106769 : f32
    %28 = vector.broadcast %cst_11 : f32 to vector<8x32xf32>
    %29 = arith.mulf %25, %28 : vector<8x32xf32>
    %30 = math.erf %29 : vector<8x32xf32>
    %cst_12 = arith.constant 1.000000e+00 : f32
    %31 = vector.broadcast %cst_12 : f32 to vector<8x32xf32>
    %32 = arith.addf %31, %30 : vector<8x32xf32>
    %33 = arith.mulf %27, %32 : vector<8x32xf32>
    %c0_13 = arith.constant 0 : index
    %c0_14 = arith.constant 0 : index
    %c0_15 = arith.constant 0 : index
    %c0_16 = arith.constant 0 : index
    %34 = vector.load %arg4[%c0_13, %c0_14, %c0_15, %c0_16] : memref<2x3x32x32xf32, #tpu.memory_space<vmem>>, vector<1x1x32x32xf32>
    %35 = vector.shape_cast %34 : vector<1x1x32x32xf32> to vector<32x32xf32>
    %cst_17 = arith.constant dense<0.000000e+00> : vector<8x32xf32>
    %36 = tpu.matmul %33, %35, %cst_17 {dimension_numbers = #tpu.dot_dimension_numbers<[1], [0], [0], [1], [0, 0, 1, 1], [], []>} : vector<8x32xf32>, vector<32x32xf32>, vector<8x32xf32> -> vector<8x32xf32>
    %c0_18 = arith.constant 0 : index
    %c0_19 = arith.constant 0 : index
    %c0_20 = arith.constant 0 : index
    %c0_21 = arith.constant 0 : index
    %37 = vector.load %arg5[%c0_18, %c0_19, %c0_20, %c0_21] : memref<2x3x1x32xf32, #tpu.memory_space<vmem>>, vector<1x1x1x32xf32>
    %38 = vector.shape_cast %37 : vector<1x1x1x32xf32> to vector<1x32xf32>
    %39 = vector.broadcast %38 : vector<1x32xf32> to vector<8x32xf32>
    %40 = arith.addf %36, %39 : vector<8x32xf32>
    %c0_22 = arith.constant 0 : index
    %c0_23 = arith.constant 0 : index
    %c0_24 = arith.constant 0 : index
    %c0_25 = arith.constant 0 : index
    %c0_26 = arith.constant 0 : index
    %41 = vector.load %arg6[%c0_22, %c0_23, %c0_24, %c0_25, %c0_26] : memref<2x3x8x2x32xf32, #tpu.memory_space<vmem>>, vector<1x1x8x1x32xf32>
    %42 = vector.shape_cast %41 : vector<1x1x8x1x32xf32> to vector<8x32xf32>
    %43 = vector.shape_cast %40 : vector<8x32xf32> to vector<1x1x8x1x32xf32>
    tpu.vector_store %arg6[%c0_22, %c0_23, %c0_24, %c0_25, %c0_26], %43 {strides = array<i32>} : memref<2x3x8x2x32xf32, #tpu.memory_space<vmem>>, vector<1x1x8x1x32xf32>,
    %c0_27 = arith.constant 0 : index
    %c1 = arith.constant 1 : index
    %c0_28 = arith.constant 0 : index
    %c0_29 = arith.constant 0 : index
    %44 = vector.load %arg4[%c0_27, %c1, %c0_28, %c0_29] : memref<2x3x32x32xf32, #tpu.memory_space<vmem>>, vector<1x1x32x32xf32>
    %45 = vector.shape_cast %44 : vector<1x1x32x32xf32> to vector<32x32xf32>
    %cst_30 = arith.constant dense<0.000000e+00> : vector<8x32xf32>
    %46 = tpu.matmul %33, %45, %cst_30 {dimension_numbers = #tpu.dot_dimension_numbers<[1], [0], [0], [1], [0, 0, 1, 1], [], []>} : vector<8x32xf32>, vector<32x32xf32>, vector<8x32xf32> -> vector<8x32xf32>
    %c0_31 = arith.constant 0 : index
    %c1_32 = arith.constant 1 : index
    %c0_33 = arith.constant 0 : index
    %c0_34 = arith.constant 0 : index
    %47 = vector.load %arg5[%c0_31, %c1_32, %c0_33, %c0_34] : memref<2x3x1x32xf32, #tpu.memory_space<vmem>>, vector<1x1x1x32xf32>
    %48 = vector.shape_cast %47 : vector<1x1x1x32xf32> to vector<1x32xf32>
    %49 = vector.broadcast %48 : vector<1x32xf32> to vector<8x32xf32>
    %50 = arith.addf %46, %49 : vector<8x32xf32>
    %c0_35 = arith.constant 0 : index
    %c1_36 = arith.constant 1 : index
    %c0_37 = arith.constant 0 : index
    %c0_38 = arith.constant 0 : index
    %c0_39 = arith.constant 0 : index
    %51 = vector.load %arg6[%c0_35, %c1_36, %c0_37, %c0_38, %c0_39] : memref<2x3x8x2x32xf32, #tpu.memory_space<vmem>>, vector<1x1x8x1x32xf32>
    %52 = vector.shape_cast %51 : vector<1x1x8x1x32xf32> to vector<8x32xf32>
    %53 = vector.shape_cast %50 : vector<8x32xf32> to vector<1x1x8x1x32xf32>
    tpu.vector_store %arg6[%c0_35, %c1_36, %c0_37, %c0_38, %c0_39], %53 {strides = array<i32>} : memref<2x3x8x2x32xf32, #tpu.memory_space<vmem>>, vector<1x1x8x1x32xf32>,
    %c0_40 = arith.constant 0 : index
    %c2 = arith.constant 2 : index
    %c0_41 = arith.constant 0 : index
    %c0_42 = arith.constant 0 : index
    %54 = vector.load %arg4[%c0_40, %c2, %c0_41, %c0_42] : memref<2x3x32x32xf32, #tpu.memory_space<vmem>>, vector<1x1x32x32xf32>
    %55 = vector.shape_cast %54 : vector<1x1x32x32xf32> to vector<32x32xf32>
    %cst_43 = arith.constant dense<0.000000e+00> : vector<8x32xf32>
    %56 = tpu.matmul %33, %55, %cst_43 {dimension_numbers = #tpu.dot_dimension_numbers<[1], [0], [0], [1], [0, 0, 1, 1], [], []>} : vector<8x32xf32>, vector<32x32xf32>, vector<8x32xf32> -> vector<8x32xf32>
    %c0_44 = arith.constant 0 : index
    %c2_45 = arith.constant 2 : index
    %c0_46 = arith.constant 0 : index
    %c0_47 = arith.constant 0 : index
    %57 = vector.load %arg5[%c0_44, %c2_45, %c0_46, %c0_47] : memref<2x3x1x32xf32, #tpu.memory_space<vmem>>, vector<1x1x1x32xf32>
    %58 = vector.shape_cast %57 : vector<1x1x1x32xf32> to vector<1x32xf32>
    %59 = vector.broadcast %58 : vector<1x32xf32> to vector<8x32xf32>
    %60 = arith.addf %56, %59 : vector<8x32xf32>
    %c0_48 = arith.constant 0 : index
    %c2_49 = arith.constant 2 : index
    %c0_50 = arith.constant 0 : index
    %c0_51 = arith.constant 0 : index
    %c0_52 = arith.constant 0 : index
    %61 = vector.load %arg6[%c0_48, %c2_49, %c0_50, %c0_51, %c0_52] : memref<2x3x8x2x32xf32, #tpu.memory_space<vmem>>, vector<1x1x8x1x32xf32>
    %62 = vector.shape_cast %61 : vector<1x1x8x1x32xf32> to vector<8x32xf32>
    %63 = vector.shape_cast %60 : vector<8x32xf32> to vector<1x1x8x1x32xf32>
    tpu.vector_store %arg6[%c0_48, %c2_49, %c0_50, %c0_51, %c0_52], %63 {strides = array<i32>} : memref<2x3x8x2x32xf32, #tpu.memory_space<vmem>>, vector<1x1x8x1x32xf32>,
    %c1_53 = arith.constant 1 : index
    %c0_54 = arith.constant 0 : index
    %c0_55 = arith.constant 0 : index
    %c0_56 = arith.constant 0 : index
    %64 = vector.load %arg4[%c1_53, %c0_54, %c0_55, %c0_56] : memref<2x3x32x32xf32, #tpu.memory_space<vmem>>, vector<1x1x32x32xf32>
    %65 = vector.shape_cast %64 : vector<1x1x32x32xf32> to vector<32x32xf32>
    %cst_57 = arith.constant dense<0.000000e+00> : vector<8x32xf32>
    %66 = tpu.matmul %33, %65, %cst_57 {dimension_numbers = #tpu.dot_dimension_numbers<[1], [0], [0], [1], [0, 0, 1, 1], [], []>} : vector<8x32xf32>, vector<32x32xf32>, vector<8x32xf32> -> vector<8x32xf32>
    %c1_58 = arith.constant 1 : index
    %c0_59 = arith.constant 0 : index
    %c0_60 = arith.constant 0 : index
    %c0_61 = arith.constant 0 : index
    %67 = vector.load %arg5[%c1_58, %c0_59, %c0_60, %c0_61] : memref<2x3x1x32xf32, #tpu.memory_space<vmem>>, vector<1x1x1x32xf32>
    %68 = vector.shape_cast %67 : vector<1x1x1x32xf32> to vector<1x32xf32>
    %69 = vector.broadcast %68 : vector<1x32xf32> to vector<8x32xf32>
    %70 = arith.addf %66, %69 : vector<8x32xf32>
    %c1_62 = arith.constant 1 : index
    %c0_63 = arith.constant 0 : index
    %c0_64 = arith.constant 0 : index
    %c0_65 = arith.constant 0 : index
    %c0_66 = arith.constant 0 : index
    %71 = vector.load %arg6[%c1_62, %c0_63, %c0_64, %c0_65, %c0_66] : memref<2x3x8x2x32xf32, #tpu.memory_space<vmem>>, vector<1x1x8x1x32xf32>
    %72 = vector.shape_cast %71 : vector<1x1x8x1x32xf32> to vector<8x32xf32>
    %73 = vector.shape_cast %70 : vector<8x32xf32> to vector<1x1x8x1x32xf32>
    tpu.vector_store %arg6[%c1_62, %c0_63, %c0_64, %c0_65, %c0_66], %73 {strides = array<i32>} : memref<2x3x8x2x32xf32, #tpu.memory_space<vmem>>, vector<1x1x8x1x32xf32>,
    %c1_67 = arith.constant 1 : index
    %c1_68 = arith.constant 1 : index
    %c0_69 = arith.constant 0 : index
    %c0_70 = arith.constant 0 : index
    %74 = vector.load %arg4[%c1_67, %c1_68, %c0_69, %c0_70] : memref<2x3x32x32xf32, #tpu.memory_space<vmem>>, vector<1x1x32x32xf32>
    %75 = vector.shape_cast %74 : vector<1x1x32x32xf32> to vector<32x32xf32>
    %cst_71 = arith.constant dense<0.000000e+00> : vector<8x32xf32>
    %76 = tpu.matmul %33, %75, %cst_71 {dimension_numbers = #tpu.dot_dimension_numbers<[1], [0], [0], [1], [0, 0, 1, 1], [], []>} : vector<8x32xf32>, vector<32x32xf32>, vector<8x32xf32> -> vector<8x32xf32>
    %c1_72 = arith.constant 1 : index
    %c1_73 = arith.constant 1 : index
    %c0_74 = arith.constant 0 : index
    %c0_75 = arith.constant 0 : index
    %77 = vector.load %arg5[%c1_72, %c1_73, %c0_74, %c0_75] : memref<2x3x1x32xf32, #tpu.memory_space<vmem>>, vector<1x1x1x32xf32>
    %78 = vector.shape_cast %77 : vector<1x1x1x32xf32> to vector<1x32xf32>
    %79 = vector.broadcast %78 : vector<1x32xf32> to vector<8x32xf32>
    %80 = arith.addf %76, %79 : vector<8x32xf32>
    %c1_76 = arith.constant 1 : index
    %c1_77 = arith.constant 1 : index
    %c0_78 = arith.constant 0 : index
    %c0_79 = arith.constant 0 : index
    %c0_80 = arith.constant 0 : index
    %81 = vector.load %arg6[%c1_76, %c1_77, %c0_78, %c0_79, %c0_80] : memref<2x3x8x2x32xf32, #tpu.memory_space<vmem>>, vector<1x1x8x1x32xf32>
    %82 = vector.shape_cast %81 : vector<1x1x8x1x32xf32> to vector<8x32xf32>
    %83 = vector.shape_cast %80 : vector<8x32xf32> to vector<1x1x8x1x32xf32>
    tpu.vector_store %arg6[%c1_76, %c1_77, %c0_78, %c0_79, %c0_80], %83 {strides = array<i32>} : memref<2x3x8x2x32xf32, #tpu.memory_space<vmem>>, vector<1x1x8x1x32xf32>,
    %c1_81 = arith.constant 1 : index
    %c2_82 = arith.constant 2 : index
    %c0_83 = arith.constant 0 : index
    %c0_84 = arith.constant 0 : index
    %84 = vector.load %arg4[%c1_81, %c2_82, %c0_83, %c0_84] : memref<2x3x32x32xf32, #tpu.memory_space<vmem>>, vector<1x1x32x32xf32>
    %85 = vector.shape_cast %84 : vector<1x1x32x32xf32> to vector<32x32xf32>
    %cst_85 = arith.constant dense<0.000000e+00> : vector<8x32xf32>
    %86 = tpu.matmul %33, %85, %cst_85 {dimension_numbers = #tpu.dot_dimension_numbers<[1], [0], [0], [1], [0, 0, 1, 1], [], []>} : vector<8x32xf32>, vector<32x32xf32>, vector<8x32xf32> -> vector<8x32xf32>
    %c1_86 = arith.constant 1 : index
    %c2_87 = arith.constant 2 : index
    %c0_88 = arith.constant 0 : index
    %c0_89 = arith.constant 0 : index
    %87 = vector.load %arg5[%c1_86, %c2_87, %c0_88, %c0_89] : memref<2x3x1x32xf32, #tpu.memory_space<vmem>>, vector<1x1x1x32xf32>
    %88 = vector.shape_cast %87 : vector<1x1x1x32xf32> to vector<1x32xf32>
    %89 = vector.broadcast %88 : vector<1x32xf32> to vector<8x32xf32>
    %90 = arith.addf %86, %89 : vector<8x32xf32>
    %c1_90 = arith.constant 1 : index
    %c2_91 = arith.constant 2 : index
    %c0_92 = arith.constant 0 : index
    %c0_93 = arith.constant 0 : index
    %c0_94 = arith.constant 0 : index
    %91 = vector.load %arg6[%c1_90, %c2_91, %c0_92, %c0_93, %c0_94] : memref<2x3x8x2x32xf32, #tpu.memory_space<vmem>>, vector<1x1x8x1x32xf32>
    %92 = vector.shape_cast %91 : vector<1x1x8x1x32xf32> to vector<8x32xf32>
    %93 = vector.shape_cast %90 : vector<8x32xf32> to vector<1x1x8x1x32xf32>
    tpu.vector_store %arg6[%c1_90, %c2_91, %c0_92, %c0_93, %c0_94], %93 {strides = array<i32>} : memref<2x3x8x2x32xf32, #tpu.memory_space<vmem>>, vector<1x1x8x1x32xf32>,
    %c1_95 = arith.constant 1 : index
    %c0_96 = arith.constant 0 : index
    %c0_97 = arith.constant 0 : index
    %94 = vector.load %arg1[%c1_95, %c0_96, %c0_97] : memref<2x8x32xf32, #tpu.memory_space<vmem>>, vector<1x8x32xf32>
    %95 = vector.shape_cast %94 : vector<1x8x32xf32> to vector<8x32xf32>
    %cst_98 = arith.constant dense<0.000000e+00> : vector<8xf32>
    %96 = vector.multi_reduction <add>, %95, %cst_98 [1] : vector<8x32xf32> to vector<8xf32>
    %97 = vector.shape_cast %96 : vector<8xf32> to vector<8x1xf32>
    %cst_99 = arith.constant 3.200000e+01 : f32
    %98 = vector.broadcast %cst_99 : f32 to vector<8x1xf32>
    %99 = arith.divf %97, %98 : vector<8x1xf32>
    %100 = vector.broadcast %99 : vector<8x1xf32> to vector<8x32xf32>
    %101 = arith.subf %95, %100 : vector<8x32xf32>
    %102 = arith.mulf %101, %101 : vector<8x32xf32>
    %cst_100 = arith.constant dense<0.000000e+00> : vector<8xf32>
    %103 = vector.multi_reduction <add>, %102, %cst_100 [1] : vector<8x32xf32> to vector<8xf32>
    %104 = vector.shape_cast %103 : vector<8xf32> to vector<8x1xf32>
    %cst_101 = arith.constant 3.200000e+01 : f32
    %105 = vector.broadcast %cst_101 : f32 to vector<8x1xf32>
    %106 = arith.divf %104, %105 : vector<8x1xf32>
    %107 = vector.broadcast %99 : vector<8x1xf32> to vector<8x32xf32>
    %108 = arith.subf %95, %107 : vector<8x32xf32>
    %cst_102 = arith.constant 9.99999974E-6 : f32
    %109 = vector.broadcast %cst_102 : f32 to vector<8x1xf32>
    %110 = arith.addf %106, %109 : vector<8x1xf32>
    %111 = math.rsqrt %110 : vector<8x1xf32>
    %112 = vector.broadcast %111 : vector<8x1xf32> to vector<8x32xf32>
    %113 = arith.mulf %108, %112 : vector<8x32xf32>
    %114 = vector.broadcast %0 : vector<1x32xf32> to vector<8x32xf32>
    %115 = arith.mulf %113, %114 : vector<8x32xf32>
    %116 = vector.broadcast %1 : vector<1x32xf32> to vector<8x32xf32>
    %117 = arith.addf %115, %116 : vector<8x32xf32>
    %cst_103 = arith.constant 5.000000e-01 : f32
    %118 = vector.broadcast %cst_103 : f32 to vector<8x32xf32>
    %119 = arith.mulf %118, %117 : vector<8x32xf32>
    %cst_104 = arith.constant 0.707106769 : f32
    %120 = vector.broadcast %cst_104 : f32 to vector<8x32xf32>
    %121 = arith.mulf %117, %120 : vector<8x32xf32>
    %122 = math.erf %121 : vector<8x32xf32>
    %cst_105 = arith.constant 1.000000e+00 : f32
    %123 = vector.broadcast %cst_105 : f32 to vector<8x32xf32>
    %124 = arith.addf %123, %122 : vector<8x32xf32>
    %125 = arith.mulf %119, %124 : vector<8x32xf32>
    %c0_106 = arith.constant 0 : index
    %c0_107 = arith.constant 0 : index
    %c0_108 = arith.constant 0 : index
    %c0_109 = arith.constant 0 : index
    %126 = vector.load %arg4[%c0_106, %c0_107, %c0_108, %c0_109] : memref<2x3x32x32xf32, #tpu.memory_space<vmem>>, vector<1x1x32x32xf32>
    %127 = vector.shape_cast %126 : vector<1x1x32x32xf32> to vector<32x32xf32>
    %cst_110 = arith.constant dense<0.000000e+00> : vector<8x32xf32>
    %128 = tpu.matmul %125, %127, %cst_110 {dimension_numbers = #tpu.dot_dimension_numbers<[1], [0], [0], [1], [0, 0, 1, 1], [], []>} : vector<8x32xf32>, vector<32x32xf32>, vector<8x32xf32> -> vector<8x32xf32>
    %c0_111 = arith.constant 0 : index
    %c0_112 = arith.constant 0 : index
    %c0_113 = arith.constant 0 : index
    %c0_114 = arith.constant 0 : index
    %129 = vector.load %arg5[%c0_111, %c0_112, %c0_113, %c0_114] : memref<2x3x1x32xf32, #tpu.memory_space<vmem>>, vector<1x1x1x32xf32>
    %130 = vector.shape_cast %129 : vector<1x1x1x32xf32> to vector<1x32xf32>
    %131 = vector.broadcast %130 : vector<1x32xf32> to vector<8x32xf32>
    %132 = arith.addf %128, %131 : vector<8x32xf32>
    %c0_115 = arith.constant 0 : index
    %c0_116 = arith.constant 0 : index
    %c0_117 = arith.constant 0 : index
    %c1_118 = arith.constant 1 : index
    %c0_119 = arith.constant 0 : index
    %133 = vector.load %arg6[%c0_115, %c0_116, %c0_117, %c1_118, %c0_119] : memref<2x3x8x2x32xf32, #tpu.memory_space<vmem>>, vector<1x1x8x1x32xf32>
    %134 = vector.shape_cast %133 : vector<1x1x8x1x32xf32> to vector<8x32xf32>
    %135 = vector.shape_cast %132 : vector<8x32xf32> to vector<1x1x8x1x32xf32>
    tpu.vector_store %arg6[%c0_115, %c0_116, %c0_117, %c1_118, %c0_119], %135 {strides = array<i32>} : memref<2x3x8x2x32xf32, #tpu.memory_space<vmem>>, vector<1x1x8x1x32xf32>,
    %c0_120 = arith.constant 0 : index
    %c1_121 = arith.constant 1 : index
    %c0_122 = arith.constant 0 : index
    %c0_123 = arith.constant 0 : index
    %136 = vector.load %arg4[%c0_120, %c1_121, %c0_122, %c0_123] : memref<2x3x32x32xf32, #tpu.memory_space<vmem>>, vector<1x1x32x32xf32>
    %137 = vector.shape_cast %136 : vector<1x1x32x32xf32> to vector<32x32xf32>
    %cst_124 = arith.constant dense<0.000000e+00> : vector<8x32xf32>
    %138 = tpu.matmul %125, %137, %cst_124 {dimension_numbers = #tpu.dot_dimension_numbers<[1], [0], [0], [1], [0, 0, 1, 1], [], []>} : vector<8x32xf32>, vector<32x32xf32>, vector<8x32xf32> -> vector<8x32xf32>
    %c0_125 = arith.constant 0 : index
    %c1_126 = arith.constant 1 : index
    %c0_127 = arith.constant 0 : index
    %c0_128 = arith.constant 0 : index
    %139 = vector.load %arg5[%c0_125, %c1_126, %c0_127, %c0_128] : memref<2x3x1x32xf32, #tpu.memory_space<vmem>>, vector<1x1x1x32xf32>
    %140 = vector.shape_cast %139 : vector<1x1x1x32xf32> to vector<1x32xf32>
    %141 = vector.broadcast %140 : vector<1x32xf32> to vector<8x32xf32>
    %142 = arith.addf %138, %141 : vector<8x32xf32>
    %c0_129 = arith.constant 0 : index
    %c1_130 = arith.constant 1 : index
    %c0_131 = arith.constant 0 : index
    %c1_132 = arith.constant 1 : index
    %c0_133 = arith.constant 0 : index
    %143 = vector.load %arg6[%c0_129, %c1_130, %c0_131, %c1_132, %c0_133] : memref<2x3x8x2x32xf32, #tpu.memory_space<vmem>>, vector<1x1x8x1x32xf32>
    %144 = vector.shape_cast %143 : vector<1x1x8x1x32xf32> to vector<8x32xf32>
    %145 = vector.shape_cast %142 : vector<8x32xf32> to vector<1x1x8x1x32xf32>
    tpu.vector_store %arg6[%c0_129, %c1_130, %c0_131, %c1_132, %c0_133], %145 {strides = array<i32>} : memref<2x3x8x2x32xf32, #tpu.memory_space<vmem>>, vector<1x1x8x1x32xf32>,
    %c0_134 = arith.constant 0 : index
    %c2_135 = arith.constant 2 : index
    %c0_136 = arith.constant 0 : index
    %c0_137 = arith.constant 0 : index
    %146 = vector.load %arg4[%c0_134, %c2_135, %c0_136, %c0_137] : memref<2x3x32x32xf32, #tpu.memory_space<vmem>>, vector<1x1x32x32xf32>
    %147 = vector.shape_cast %146 : vector<1x1x32x32xf32> to vector<32x32xf32>
    %cst_138 = arith.constant dense<0.000000e+00> : vector<8x32xf32>
    %148 = tpu.matmul %125, %147, %cst_138 {dimension_numbers = #tpu.dot_dimension_numbers<[1], [0], [0], [1], [0, 0, 1, 1], [], []>} : vector<8x32xf32>, vector<32x32xf32>, vector<8x32xf32> -> vector<8x32xf32>
    %c0_139 = arith.constant 0 : index
    %c2_140 = arith.constant 2 : index
    %c0_141 = arith.constant 0 : index
    %c0_142 = arith.constant 0 : index
    %149 = vector.load %arg5[%c0_139, %c2_140, %c0_141, %c0_142] : memref<2x3x1x32xf32, #tpu.memory_space<vmem>>, vector<1x1x1x32xf32>
    %150 = vector.shape_cast %149 : vector<1x1x1x32xf32> to vector<1x32xf32>
    %151 = vector.broadcast %150 : vector<1x32xf32> to vector<8x32xf32>
    %152 = arith.addf %148, %151 : vector<8x32xf32>
    %c0_143 = arith.constant 0 : index
    %c2_144 = arith.constant 2 : index
    %c0_145 = arith.constant 0 : index
    %c1_146 = arith.constant 1 : index
    %c0_147 = arith.constant 0 : index
    %153 = vector.load %arg6[%c0_143, %c2_144, %c0_145, %c1_146, %c0_147] : memref<2x3x8x2x32xf32, #tpu.memory_space<vmem>>, vector<1x1x8x1x32xf32>
    %154 = vector.shape_cast %153 : vector<1x1x8x1x32xf32> to vector<8x32xf32>
    %155 = vector.shape_cast %152 : vector<8x32xf32> to vector<1x1x8x1x32xf32>
    tpu.vector_store %arg6[%c0_143, %c2_144, %c0_145, %c1_146, %c0_147], %155 {strides = array<i32>} : memref<2x3x8x2x32xf32, #tpu.memory_space<vmem>>, vector<1x1x8x1x32xf32>,
    %c1_148 = arith.constant 1 : index
    %c0_149 = arith.constant 0 : index
    %c0_150 = arith.constant 0 : index
    %c0_151 = arith.constant 0 : index
    %156 = vector.load %arg4[%c1_148, %c0_149, %c0_150, %c0_151] : memref<2x3x32x32xf32, #tpu.memory_space<vmem>>, vector<1x1x32x32xf32>
    %157 = vector.shape_cast %156 : vector<1x1x32x32xf32> to vector<32x32xf32>
    %cst_152 = arith.constant dense<0.000000e+00> : vector<8x32xf32>
    %158 = tpu.matmul %125, %157, %cst_152 {dimension_numbers = #tpu.dot_dimension_numbers<[1], [0], [0], [1], [0, 0, 1, 1], [], []>} : vector<8x32xf32>, vector<32x32xf32>, vector<8x32xf32> -> vector<8x32xf32>
    %c1_153 = arith.constant 1 : index
    %c0_154 = arith.constant 0 : index
    %c0_155 = arith.constant 0 : index
    %c0_156 = arith.constant 0 : index
    %159 = vector.load %arg5[%c1_153, %c0_154, %c0_155, %c0_156] : memref<2x3x1x32xf32, #tpu.memory_space<vmem>>, vector<1x1x1x32xf32>
    %160 = vector.shape_cast %159 : vector<1x1x1x32xf32> to vector<1x32xf32>
    %161 = vector.broadcast %160 : vector<1x32xf32> to vector<8x32xf32>
    %162 = arith.addf %158, %161 : vector<8x32xf32>
    %c1_157 = arith.constant 1 : index
    %c0_158 = arith.constant 0 : index
    %c0_159 = arith.constant 0 : index
    %c1_160 = arith.constant 1 : index
    %c0_161 = arith.constant 0 : index
    %163 = vector.load %arg6[%c1_157, %c0_158, %c0_159, %c1_160, %c0_161] : memref<2x3x8x2x32xf32, #tpu.memory_space<vmem>>, vector<1x1x8x1x32xf32>
    %164 = vector.shape_cast %163 : vector<1x1x8x1x32xf32> to vector<8x32xf32>
    %165 = vector.shape_cast %162 : vector<8x32xf32> to vector<1x1x8x1x32xf32>
    tpu.vector_store %arg6[%c1_157, %c0_158, %c0_159, %c1_160, %c0_161], %165 {strides = array<i32>} : memref<2x3x8x2x32xf32, #tpu.memory_space<vmem>>, vector<1x1x8x1x32xf32>,
    %c1_162 = arith.constant 1 : index
    %c1_163 = arith.constant 1 : index
    %c0_164 = arith.constant 0 : index
    %c0_165 = arith.constant 0 : index
    %166 = vector.load %arg4[%c1_162, %c1_163, %c0_164, %c0_165] : memref<2x3x32x32xf32, #tpu.memory_space<vmem>>, vector<1x1x32x32xf32>
    %167 = vector.shape_cast %166 : vector<1x1x32x32xf32> to vector<32x32xf32>
    %cst_166 = arith.constant dense<0.000000e+00> : vector<8x32xf32>
    %168 = tpu.matmul %125, %167, %cst_166 {dimension_numbers = #tpu.dot_dimension_numbers<[1], [0], [0], [1], [0, 0, 1, 1], [], []>} : vector<8x32xf32>, vector<32x32xf32>, vector<8x32xf32> -> vector<8x32xf32>
    %c1_167 = arith.constant 1 : index
    %c1_168 = arith.constant 1 : index
    %c0_169 = arith.constant 0 : index
    %c0_170 = arith.constant 0 : index
    %169 = vector.load %arg5[%c1_167, %c1_168, %c0_169, %c0_170] : memref<2x3x1x32xf32, #tpu.memory_space<vmem>>, vector<1x1x1x32xf32>
    %170 = vector.shape_cast %169 : vector<1x1x1x32xf32> to vector<1x32xf32>
    %171 = vector.broadcast %170 : vector<1x32xf32> to vector<8x32xf32>
    %172 = arith.addf %168, %171 : vector<8x32xf32>
    %c1_171 = arith.constant 1 : index
    %c1_172 = arith.constant 1 : index
    %c0_173 = arith.constant 0 : index
    %c1_174 = arith.constant 1 : index
    %c0_175 = arith.constant 0 : index
    %173 = vector.load %arg6[%c1_171, %c1_172, %c0_173, %c1_174, %c0_175] : memref<2x3x8x2x32xf32, #tpu.memory_space<vmem>>, vector<1x1x8x1x32xf32>
    %174 = vector.shape_cast %173 : vector<1x1x8x1x32xf32> to vector<8x32xf32>
    %175 = vector.shape_cast %172 : vector<8x32xf32> to vector<1x1x8x1x32xf32>
    tpu.vector_store %arg6[%c1_171, %c1_172, %c0_173, %c1_174, %c0_175], %175 {strides = array<i32>} : memref<2x3x8x2x32xf32, #tpu.memory_space<vmem>>, vector<1x1x8x1x32xf32>,
    %c1_176 = arith.constant 1 : index
    %c2_177 = arith.constant 2 : index
    %c0_178 = arith.constant 0 : index
    %c0_179 = arith.constant 0 : index
    %176 = vector.load %arg4[%c1_176, %c2_177, %c0_178, %c0_179] : memref<2x3x32x32xf32, #tpu.memory_space<vmem>>, vector<1x1x32x32xf32>
    %177 = vector.shape_cast %176 : vector<1x1x32x32xf32> to vector<32x32xf32>
    %cst_180 = arith.constant dense<0.000000e+00> : vector<8x32xf32>
    %178 = tpu.matmul %125, %177, %cst_180 {dimension_numbers = #tpu.dot_dimension_numbers<[1], [0], [0], [1], [0, 0, 1, 1], [], []>} : vector<8x32xf32>, vector<32x32xf32>, vector<8x32xf32> -> vector<8x32xf32>
    %c1_181 = arith.constant 1 : index
    %c2_182 = arith.constant 2 : index
    %c0_183 = arith.constant 0 : index
    %c0_184 = arith.constant 0 : index
    %179 = vector.load %arg5[%c1_181, %c2_182, %c0_183, %c0_184] : memref<2x3x1x32xf32, #tpu.memory_space<vmem>>, vector<1x1x1x32xf32>
    %180 = vector.shape_cast %179 : vector<1x1x1x32xf32> to vector<1x32xf32>
    %181 = vector.broadcast %180 : vector<1x32xf32> to vector<8x32xf32>
    %182 = arith.addf %178, %181 : vector<8x32xf32>
    %c1_185 = arith.constant 1 : index
    %c2_186 = arith.constant 2 : index
    %c0_187 = arith.constant 0 : index
    %c1_188 = arith.constant 1 : index
    %c0_189 = arith.constant 0 : index
    %183 = vector.load %arg6[%c1_185, %c2_186, %c0_187, %c1_188, %c0_189] : memref<2x3x8x2x32xf32, #tpu.memory_space<vmem>>, vector<1x1x8x1x32xf32>
    %184 = vector.shape_cast %183 : vector<1x1x8x1x32xf32> to vector<8x32xf32>
    %185 = vector.shape_cast %182 : vector<8x32xf32> to vector<1x1x8x1x32xf32>
    tpu.vector_store %arg6[%c1_185, %c2_186, %c0_187, %c1_188, %c0_189], %185 {strides = array<i32>} : memref<2x3x8x2x32xf32, #tpu.memory_space<vmem>>, vector<1x1x8x1x32xf32>,
    return
  }
  func.func @transform_0(%arg0: i32) -> (i32, i32, i32) {
    %c0_i32 = arith.constant 0 : i32
    %c0_i32_0 = arith.constant 0 : i32
    %c0_i32_1 = arith.constant 0 : i32
    return %c0_i32, %arg0, %c0_i32_0 : i32, i32, i32
  }
  func.func @transform_1(%arg0: i32) -> (i32, i32) {
    %c0_i32 = arith.constant 0 : i32
    %c0_i32_0 = arith.constant 0 : i32
    %c0_i32_1 = arith.constant 0 : i32
    return %c0_i32, %c0_i32_0 : i32, i32
  }
  func.func @transform_2(%arg0: i32) -> (i32, i32) {
    %c0_i32 = arith.constant 0 : i32
    %c0_i32_0 = arith.constant 0 : i32
    %c0_i32_1 = arith.constant 0 : i32
    return %c0_i32, %c0_i32_0 : i32, i32
  }
  func.func @transform_3(%arg0: i32) -> (i32, i32, i32, i32) {
    %c0_i32 = arith.constant 0 : i32
    %c0_i32_0 = arith.constant 0 : i32
    %c0_i32_1 = arith.constant 0 : i32
    %c0_i32_2 = arith.constant 0 : i32
    %c0_i32_3 = arith.constant 0 : i32
    return %c0_i32, %c0_i32_0, %c0_i32_1, %c0_i32_2 : i32, i32, i32, i32
  }
  func.func @transform_4(%arg0: i32) -> (i32, i32, i32, i32) {
    %c0_i32 = arith.constant 0 : i32
    %c0_i32_0 = arith.constant 0 : i32
    %c0_i32_1 = arith.constant 0 : i32
    %c0_i32_2 = arith.constant 0 : i32
    %c0_i32_3 = arith.constant 0 : i32
    return %c0_i32, %c0_i32_0, %c0_i32_1, %c0_i32_2 : i32, i32, i32, i32
  }
  func.func @transform_5(%arg0: i32) -> (i32, i32, i32, i32, i32) {
    %c0_i32 = arith.constant 0 : i32
    %c0_i32_0 = arith.constant 0 : i32
    %c0_i32_1 = arith.constant 0 : i32
    %c0_i32_2 = arith.constant 0 : i32
    %c0_i32_3 = arith.constant 0 : i32
    return %c0_i32, %c0_i32_0, %arg0, %c0_i32_1, %c0_i32_2 : i32, i32, i32, i32, i32
  }
}

</mosaic_0001>

<bundles_post_ra>
// kernel: tpu_custom_call.1
= control target key start
LH: loop header
LB: loop body
LE: loop exit
PB: predicated region body
PF: predicated region fallthrough
CT: control target
= control target key end

     0   :  { %10 = vsyncpa [#allocation3], 0  ;;  %s2803_s0 = inlined_call_operand.hbm [shape: f32[2,8,32], index: 0, kind: input, shape index: {}]   ;;  %s2804_s1 = inlined_call_operand.hbm [shape: f32[1,32], index: 1, kind: input, shape index: {}]   ;;  %s2805_s2 = inlined_call_operand.hbm [shape: f32[1,32], index: 2, kind: input, shape index: {}]   ;;  %s2806_s3 = inlined_call_operand.hbm [shape: f32[2,3,32,32], index: 3, kind: input, shape index: {}]   ;;  %s2807_s4 = inlined_call_operand.hbm [shape: f32[2,3,1,32], index: 4, kind: input, shape index: {}]   ;;  %s2808_s5 = inlined_call_operand.hbm [shape: f32[2,3,8,2,32], index: 5, kind: output, shape index: {}]  }
   0x1   :  { %11 = vsyncpa [#allocation6], 0 }
   0x2   :  { %12 = vsyncpa [#allocation9], 0 }
   0x3   :  { %13 = vsyncpa [#allocation4], 0  ;;  %s2403_s18 = smov [#allocation5]   ;;  %s2263_s22 = scalar_lea.hbm %s2804_s1, 16 }
   0x4   :  { %s32_s19 = sshll.u32 %s2403_s18, 4  ;;  %p2264_p0 = scmp.ne.s32.totalorder %s2804_s1, %s2263_s22  ;;  %s33_s19 = int_to_ptr.vmem [resolvable:$true] %s32_s19 }
   0x5   :  { %p2267_p1 = scmp.lt.u32.totalorder %s2263_s22, %s2804_s1 }
   0x7   :  { %p2269_p2 = pnand %p2267_p1, %p2264_p0 }
   0x9   :  { %2272 = shalt.err (!%p2269_p2)
}
   0xa   :  { %s2273_s27 = scalar_lea.vmem %s33_s19, 16  ;;  %s2277_s28 = scalar_lea.vmem %s33_s19, 32 }
   0xb   :  { %p2274_p3 = scmp.ne.s32.totalorder %s33_s19, %s2273_s27  ;;  %p2278_p4 = scmp.lt.s32.totalorder %s33_s19, %s33_s19 }
   0xc   :  { %p2279_p5 = scmp.lt.s32.totalorder %s2277_s28, %s2273_s27 }
   0xe   :  { %p2280_p6 = por %p2279_p5, %p2278_p4 }
  0x10   :  { %p2281_p7 = pnand %p2280_p6, %p2274_p3 }
  0x12   :  { %2284 = shalt.err (!%p2281_p7)
}
  0x13   :  { %35 = dma.hbm_to_vmem [thread:$0]  %s2804_s1, 16, %s33_s19, [#allocation6]  }
  0x14   :  { %s2404_s6 = smov [#allocation8]   ;;  %s2405_s8 = smov [#allocation2]  }
  0x15   :  { %s51_s7 = sshll.u32 %s2404_s6, 4  ;;  %s19_s9 = sshll.u32 %s2405_s8, 4  ;;  %s52_s7 = int_to_ptr.vmem [resolvable:$true] %s51_s7  ;;  %s20_s9 = int_to_ptr.vmem [resolvable:$true] %s19_s9 }
  0x16   :  { %s2285_s12 = scalar_lea.hbm %s2806_s3, 3072 }
  0x17   :  { %p2286_p8 = scmp.ne.s32.totalorder %s2806_s3, %s2285_s12  ;;  %p2289_p9 = scmp.lt.u32.totalorder %s2285_s12, %s2806_s3 }
  0x19   :  { %p2291_p10 = pnand %p2289_p9, %p2286_p8 }
  0x1b   :  { %2294 = shalt.err (!%p2291_p10)
}
  0x1c   :  { %s2295_s1 = scalar_lea.vmem %s52_s7, 3072  ;;  %p2300_p12 = scmp.lt.s32.totalorder %s52_s7, %s52_s7 }
  0x1d   :  { %p2296_p11 = scmp.ne.s32.totalorder %s52_s7, %s2295_s1  ;;  %p2301_p13 = scmp.lt.s32.totalorder %s2295_s1, %s2295_s1 }
  0x1f   :  { %p2302_p0 = por %p2301_p13, %p2300_p12 }
  0x21   :  { %p2303_p1 = pnand %p2302_p0, %p2296_p11 }
  0x23   :  { %2306 = shalt.err (!%p2303_p1)
}
  0x24   :  { %s2406_s17 = smov 128   ;;  %s2407_s18 = smov 8  }
  0x25   :  { %57 = dma.hbm_to_vmem [thread:$0]  %s2806_s3, 3072, %s52_s7, [#allocation9], %s2406_s17, %s2406_s17, %s2407_s18  }
  0x26   :  { %s2307_s23 = scalar_lea.hbm %s2803_s0, 256 }
  0x27   :  { %p2308_p2 = scmp.ne.s32.totalorder %s2803_s0, %s2307_s23  ;;  %p2311_p3 = scmp.lt.u32.totalorder %s2307_s23, %s2803_s0 }
  0x29   :  { %p2313_p4 = pnand %p2311_p3, %p2308_p2 }
  0x2b   :  { %2316 = shalt.err (!%p2313_p4)
}
  0x2c   :  { %s2317_s28 = scalar_lea.vmem %s20_s9, 256  ;;  %p2322_p6 = scmp.lt.s32.totalorder %s20_s9, %s20_s9 }
  0x2d   :  { %p2318_p5 = scmp.ne.s32.totalorder %s20_s9, %s2317_s28  ;;  %p2323_p7 = scmp.lt.s32.totalorder %s2317_s28, %s2317_s28 }
  0x2f   :  { %p2324_p8 = por %p2323_p7, %p2322_p6 }
  0x31   :  { %p2325_p9 = pnand %p2324_p8, %p2318_p5 }
  0x33   :  { %2328 = shalt.err (!%p2325_p9)
}
  0x34   :  { %25 = dma.hbm_to_vmem [thread:$0]  %s2803_s0, 256, %s20_s9, [#allocation3], %s2406_s17, %s2406_s17, %s2407_s18  }
  0x35   :  { %s2408_s30 = smov [#allocation7]   ;;  %s2409_s7 = smov [#allocation10]  }
  0x36   :  { %s42_s6 = sshll.u32 %s2408_s30, 4  ;;  %s63_s8 = sshll.u32 %s2409_s7, 4  ;;  %s43_s6 = int_to_ptr.vmem [resolvable:$true] %s42_s6  ;;  %s64_s8 = int_to_ptr.vmem [resolvable:$true] %s63_s8 }
  0x37   :  { %s2329_s12 = scalar_lea.hbm %s2805_s2, 16 }
  0x38   :  { %p2330_p10 = scmp.ne.s32.totalorder %s2805_s2, %s2329_s12  ;;  %p2333_p11 = scmp.lt.u32.totalorder %s2329_s12, %s2805_s2 }
  0x3a   :  { %p2335_p12 = pnand %p2333_p11, %p2330_p10 }
  0x3c   :  { %2338 = shalt.err (!%p2335_p12)
}
  0x3d   :  { %s2339_s0 = scalar_lea.vmem %s43_s6, 16  ;;  %s2343_s9 = scalar_lea.vmem %s43_s6, 32 }
  0x3e   :  { %p2340_p13 = scmp.ne.s32.totalorder %s43_s6, %s2339_s0  ;;  %p2344_p0 = scmp.lt.s32.totalorder %s43_s6, %s43_s6 }
  0x3f   :  { %p2345_p1 = scmp.lt.s32.totalorder %s2343_s9, %s2339_s0 }
  0x41   :  { %p2346_p2 = por %p2345_p1, %p2344_p0 }
  0x43   :  { %p2347_p3 = pnand %p2346_p2, %p2340_p13 }
  0x45   :  { %2350 = shalt.err (!%p2347_p3)
}
  0x46   :  { %45 = dma.hbm_to_vmem [thread:$0]  %s2805_s2, 16, %s43_s6, [#allocation6]  }
  0x47   :  { %s2351_s20 = scalar_lea.hbm %s2807_s4, 96 }
  0x48   :  { %p2352_p4 = scmp.ne.s32.totalorder %s2807_s4, %s2351_s20  ;;  %p2355_p5 = scmp.lt.u32.totalorder %s2351_s20, %s2807_s4 }
  0x4a   :  { %p2357_p6 = pnand %p2355_p5, %p2352_p4 }
  0x4c   :  { %2360 = shalt.err (!%p2357_p6)
}
  0x4d   :  { %s2361_s25 = scalar_lea.vmem %s64_s8, 96  ;;  %p2366_p8 = scmp.lt.s32.totalorder %s64_s8, %s64_s8 }
  0x4e   :  { %p2362_p7 = scmp.ne.s32.totalorder %s64_s8, %s2361_s25  ;;  %p2367_p9 = scmp.lt.s32.totalorder %s2361_s25, %s2361_s25 }
  0x50   :  { %p2368_p10 = por %p2367_p9, %p2366_p8 }
  0x52   :  { %p2369_p11 = pnand %p2368_p10, %p2362_p7 }
  0x54   :  { %2372 = shalt.err (!%p2369_p11)
}
  0x55   :  { %s2410_s2 = smov 16   ;;  %s2411_s26 = smov 1  }
  0x56   :  { %69 = dma.hbm_to_vmem [thread:$0]  %s2807_s4, 96, %s64_s8, [#allocation9], %s2410_s2, %s2410_s2, %s2411_s26  }
  0x57   :  { %2395 = dma.done.wait [#allocation3], 256  }
  0x58   :  { %2396 = vsyncadd [#allocation3], 4294967040 }
  0x59   :  { %2397 = dma.done.wait [#allocation6], 32  }
  0x5a   :  { %2398 = vsyncadd [#allocation6], 4294967264 }
  0x5b   :  { %2399 = dma.done.wait [#allocation9], 3168  }
  0x5c   :  { %2400 = vsyncadd [#allocation9], 4294964128  ;;  %vm88_vm0 = vcmask 261120   ;;  %v87_v0 = vld [vmem:[#allocation2] sm:$0xff]  ;;  %v1024_v1 = vld [vmem:[#allocation2 + $0x8] sm:$0xff]  ;;  %v2412_v17 = vmov 0.0|0.0  }
  0x5d   :  { %v89_v2 = vsel %vm88_vm0, %v87_v0, 0.0  ;;  %v1025_v3 = vsel %vm88_vm0, %v1024_v1, 0.0  ;;  %v122_v14 = vld [vmem:[#allocation8] sm:$0xff]  ;;  %v123_v15 = vld [vmem:[#allocation8 + $0x8] sm:$0xff]  ;;  %2167 = vmatprep.subr.bf16.mxu0 %v2412_v17  ;;  %2173 = vmatprep.subr.bf16.mxu1 %v2412_v17  ;;  %v124_v20 = vld [vmem:[#allocation8 + $0x10] sm:$0xff]  ;;  %vm2413_vm1 = vmmov 0  }
  0x5e   :  { %90 = vadd.xlane.f32.xlu0 %v89_v2  ;;  %v274_v16 = vld [vmem:[#allocation8 + $0x20] sm:$0xff]  ;;  %v2515_v18 = vpack.c.bf16 %v123_v15, %v122_v14  ;;  %v275_v19 = vld [vmem:[#allocation8 + $0x28] sm:$0xff]  ;;  %v125_v21 = vld [vmem:[#allocation8 + $0x18] sm:$0xff]  ;;  %v2414_v25 = vmov 0.0   ;;  %v2415_v14 = vmov 1966171168  }
  0x5f   :  { %v2517_v22 = vpack.c.bf16 %v275_v19, %v274_v16  ;;  %v276_v23 = vld [vmem:[#allocation8 + $0x30] sm:$0xff]  ;;  %v277_v24 = vld [vmem:[#allocation8 + $0x38] sm:$0xff]  ;;  %2043 = vmatprep.mubr.msk.f32.mxu0 %vm2413_vm1, %v2414_v25  ;;  %2054 = vmatprep.mubr.msk.f32.mxu1 %vm2413_vm1, %v2414_v25  ;;  %v2524_v26 = vpack.c.bf16 %v125_v21, %v124_v20  ;;  %v424_v44 = vld [vmem:[#allocation8 + $0x40] sm:$0xff]  ;;  %v209_v15 = vunpack.c.l.s4 %v2415_v14  ;;  %v211_v16 = vlaneseq  ;;  %s2416_s4 = smov [#allocation11]  }
  0x60   :  { %2169 = vmatpush3.bf16.msra.mxu0 %v2515_v18  ;;  %v2528_v27 = vpack.c.bf16 %v277_v24, %v276_v23  ;;  %v1949_v35 = vld [vmem:[#allocation5] ss:$0 sm:$0xff]  ;;  %v1950_v37 = vld [vmem:[#allocation7] ss:$0 sm:$0xff]  ;;  %v425_v45 = vld [vmem:[#allocation8 + $0x48] sm:$0xff]  ;;  %vm264_vm2 = vcmask 253952  }
  0x61   :  { %2175 = vmatpush3.bf16.msra.mxu1 %v2517_v22  ;;  %2170 = vmatprep.subr.bf16.mxu0 %v2412_v17  ;;  %v574_v46 = vld [vmem:[#allocation8 + $0x60] sm:$0xff]  ;;  %v575_v47 = vld [vmem:[#allocation8 + $0x68] sm:$0xff]  ;;  %v2535_v52 = vpack.c.bf16 %v425_v45, %v424_v44  ;;  %v426_v54 = vld [vmem:[#allocation8 + $0x50] sm:$0xff]  ;;  %v212_v19 = vshrl.u32 %v211_v16, 7  ;;  %s1935_s3 = sshll.u32 %s2416_s4, 4  ;;  %s1936_s3 = int_to_ptr.vmem [resolvable:$true] %s1935_s3 }
  0x62   :  { %1026 = vadd.xlane.f32.xlu0 %v1025_v3  ;;  %2176 = vmatprep.subr.bf16.mxu1 %v2412_v17  ;;  %v2537_v53 = vpack.c.bf16 %v575_v47, %v574_v46  ;;  %v427_v56 = vld [vmem:[#allocation8 + $0x58] sm:$0xff]  ;;  %v576_v57 = vld [vmem:[#allocation8 + $0x70] sm:$0xff]  ;;  %v724_v62 = vld [vmem:[#allocation8 + $0x80] sm:$0xff]  ;;  %s2373_s29 = scalar_lea.vmem %s1936_s3, 1536  ;;  %p2378_p13 = scmp.lt.s32.totalorder %s1936_s3, %s1936_s3 }
  0x63   :  { %v577_v58 = vld [vmem:[#allocation8 + $0x78] sm:$0xff]  ;;  %v2183_v60 = vpack.c.bf16 %v427_v56, %v426_v54  ;;  %v725_v63 = vld [vmem:[#allocation8 + $0x88] sm:$0xff]  ;;  %v2597_v20 = vld [vmem:[#allocation10] ss:$0 sm:$0xff]  ;;  %p2374_p12 = scmp.ne.s32.totalorder %s1936_s3, %s2373_s29  ;;  %p2379_p0 = scmp.lt.s32.totalorder %s2373_s29, %s2373_s29 }
  0x64   :  { %2172 = vmatpush3.bf16.msra.mxu0 %v2524_v26  ;;  %v2189_v61 = vpack.c.bf16 %v577_v58, %v576_v57  ;;  %v2192_v2 = vpack.c.bf16 %v725_v63, %v724_v62 }
  0x65   :  { %2178 = vmatpush3.bf16.msra.mxu1 %v2528_v27  ;;  %2179 = vmatprep.subr.bf16.mxu0 %v2412_v17  ;;  %p2380_p1 = por %p2379_p0, %p2378_p13 }
  0x66   :  { %2185 = vmatprep.subr.bf16.mxu1 %v2412_v17 }
  0x67   :  { %p2381_p2 = pnand %p2380_p1, %p2374_p12 }
  0xeb   :  { %v91_v4 = vpop.xlane.xlu0 %90 }
  0xec   :  { %v93_v5 = vmul.f32 0.03125, %v91_v4  ;;  %v726_v4 = vld [vmem:[#allocation8 + $0x90] sm:$0xff] }
  0xee   :  { %v94_v6 = vsub.f32 %v87_v0, %v93_v5  ;;  %v874_v0 = vld [vmem:[#allocation8 + $0xa0] sm:$0xff]  ;;  %v727_v5 = vld [vmem:[#allocation8 + $0x98] sm:$0xff] }
  0xef   :  { %v1027_v7 = vpop.xlane.xlu0 %1026 }
  0xf0   :  { %v1028_v8 = vmul.f32 0.03125, %v1027_v7  ;;  %v95_v9 = vmul.f32 %v94_v6, %v94_v6  ;;  %v877_v7 = vld [vmem:[#allocation8 + $0xb8] sm:$0xff] }
  0xf2   :  { %v1029_v10 = vsub.f32 %v1024_v1, %v1028_v8  ;;  %v96_v11 = vsel %vm88_vm0, %v95_v9, 0.0  ;;  %v875_v1 = vld [vmem:[#allocation8 + $0xa8] sm:$0xff]  ;;  %v2195_v8 = vpack.c.bf16 %v727_v5, %v726_v4 }
  0xf3   :  { %97 = vadd.xlane.f32.xlu1 %v96_v11  ;;  %v2198_v3 = vpack.c.bf16 %v875_v1, %v874_v0 }
  0xf4   :  { %v1030_v12 = vmul.f32 %v1029_v10, %v1029_v10 }
  0xf6   :  { %v1031_v13 = vsel %vm88_vm0, %v1030_v12, 0.0 }
  0xf7   :  { %1032 = vadd.xlane.f32.xlu1 %v1031_v13 }
 0x180   :  { %v98_v28 = vpop.xlane.xlu1 %97 }
 0x181   :  { %v99_v29 = vmul.f32 0.03125, %v98_v28 }
 0x183   :  { %v100_v30 = vadd.f32 1e-05, %v99_v29 }
 0x184   :  { %v1033_v31 = vpop.xlane.xlu1 %1032 }
 0x185   :  { %2255 = vrsqrt.f32 %v100_v30  ;;  %v1034_v32 = vmul.f32 0.03125, %v1033_v31 }
 0x187   :  { %v1035_v33 = vadd.f32 1e-05, %v1034_v32 }
 0x189   :  { %2257 = vrsqrt.f32 %v1035_v33 }
 0x18f   :  { %v2256_v34 = vpop.eup %2255 }
 0x190   :  { %v102_v36 = vmul.f32 %v2256_v34, %v94_v6  ;;  %v876_v6 = vld [vmem:[#allocation8 + $0xb0] sm:$0xff] }
 0x191   :  { %v2201_v9 = vpack.c.bf16 %v877_v7, %v876_v6 }
 0x192   :  { %v109_v38 = vmul.f32 %v1949_v35, %v102_v36 }
 0x193   :  { %v2258_v41 = vpop.eup %2257 }
 0x194   :  { %v116_v39 = vadd.f32 %v1950_v37, %v109_v38  ;;  %v1037_v42 = vmul.f32 %v2258_v41, %v1029_v10  ;;  %v2611_v38 = vld [vmem:[#allocation10 + $0x2] ss:$0 sm:$0xff] }
 0x196   :  { %v118_v40 = vmul.f32 0.70710677, %v116_v39  ;;  %v1038_v43 = vmul.f32 %v1949_v35, %v1037_v42  ;;  %v117_v49 = vmul.f32 0.5, %v116_v39 }
 0x198   :  { %2259 = verf.f32 %v118_v40  ;;  %v1039_v51 = vadd.f32 %v1950_v37, %v1038_v43  ;;  %v2616_v43 = vld [vmem:[#allocation10 + $0x3] ss:$0 sm:$0xff] }
 0x19a   :  { %v1041_v59 = vmul.f32 0.70710677, %v1039_v51  ;;  %v1040_v12 = vmul.f32 0.5, %v1039_v51 }
 0x19c   :  { %2261 = verf.f32 %v1041_v59 }
 0x1a2   :  { %v2260_v48 = vpop.eup %2259 }
 0x1a3   :  { %v120_v50 = vadd.f32 1.0, %v2260_v48 }
 0x1a5   :  { %v121_v55 = vmul.f32 %v120_v50, %v117_v49 }
 0x1a6   :  { %v2262_v10 = vpop.eup %2261 }
 0x1a7   :  { %2044 = vmatmul.mubr.msk.f32.vlgmr.msra.gmra.mrb[0].mxu0 %vm88_vm0, %v121_v55  ;;  %2055 = vmatmul.mubr.msk.f32.vlgmr.msra.gmra.mrb[0].mxu1 %vm88_vm0, %v121_v55  ;;  %v1043_v11 = vadd.f32 1.0, %v2262_v10 }
 0x1a8   :  { %2181 = vmatpush3.bf16.msra.mxu0 %v2535_v52  ;;  %2187 = vmatpush3.bf16.msra.mxu1 %v2537_v53 }
 0x1a9   :  { %2182 = vmatprep.subr.bf16.mxu0 %v2412_v17  ;;  %2188 = vmatprep.subr.bf16.mxu1 %v2412_v17  ;;  %v1044_v13 = vmul.f32 %v1043_v11, %v1040_v12 }
 0x1aa   :  { %2065 = vmatprep.mubr.msk.f32.mxu0 %vm2413_vm1, %v2414_v25  ;;  %2076 = vmatprep.mubr.msk.f32.mxu1 %vm2413_vm1, %v2414_v25 }
 0x1ac   :  { %2184 = vmatpush3.bf16.msra.mxu0 %v2183_v60  ;;  %2190 = vmatpush3.bf16.msra.mxu1 %v2189_v61 }
 0x1ad   :  { %2191 = vmatprep.subr.bf16.mxu0 %v2412_v17  ;;  %2197 = vmatprep.subr.bf16.mxu1 %v2412_v17 }
 0x1af   :  { %2066 = vmatmul.mubr.msk.f32.vlgmr.msra.gmra.mrb[2].mxu0 %vm88_vm0, %v121_v55  ;;  %2077 = vmatmul.mubr.msk.f32.vlgmr.msra.gmra.mrb[2].mxu1 %vm88_vm0, %v121_v55 }
 0x1b0   :  { %2193 = vmatpush3.bf16.msra.mxu0 %v2192_v2  ;;  %2199 = vmatpush3.bf16.msra.mxu1 %v2198_v3 }
 0x1b1   :  { %2194 = vmatprep.subr.bf16.mxu0 %v2412_v17  ;;  %2200 = vmatprep.subr.bf16.mxu1 %v2412_v17 }
 0x1b2   :  { %2087 = vmatprep.mubr.msk.f32.mxu0 %vm2413_vm1, %v2414_v25  ;;  %2098 = vmatprep.mubr.msk.f32.mxu1 %vm2413_vm1, %v2414_v25 }
 0x1b4   :  { %2196 = vmatpush3.bf16.msra.mxu0 %v2195_v8  ;;  %2202 = vmatpush3.bf16.msra.mxu1 %v2201_v9 }
 0x1b5   :  { %2203 = vmatprep.subr.bf16.mxu0 %v2412_v17  ;;  %2209 = vmatprep.subr.bf16.mxu1 %v2412_v17 }
 0x1b7   :  { %2088 = vmatmul.mubr.msk.f32.vlgmr.msra.gmra.mrb[4].mxu0 %vm88_vm0, %v121_v55  ;;  %2099 = vmatmul.mubr.msk.f32.vlgmr.msra.gmra.mrb[4].mxu1 %vm88_vm0, %v121_v55 }
 0x1b8   :  { %2205 = vmatpush3.bf16.msra.mxu0 %v2515_v18  ;;  %2211 = vmatpush3.bf16.msra.mxu1 %v2517_v22  ;;  %v210_v18 = vunpack.c.0.s8 %v209_v15 }
 0x1b9   :  { %2206 = vmatprep.subr.bf16.mxu0 %v2412_v17  ;;  %2212 = vmatprep.subr.bf16.mxu1 %v2412_v17 }
 0x1ba   :  { %2109 = vmatprep.mubr.msk.f32.mxu0 %vm2413_vm1, %v2414_v25  ;;  %2120 = vmatprep.mubr.msk.f32.mxu1 %vm2413_vm1, %v2414_v25  ;;  %v2601_v21 = vsub.s32 %v210_v18, %v212_v19 }
 0x1bc   :  { %2208 = vmatpush3.bf16.msra.mxu0 %v2524_v26  ;;  %2214 = vmatpush3.bf16.msra.mxu1 %v2528_v27 }
 0x1bd   :  { %2215 = vmatprep.subr.bf16.mxu0 %v2412_v17  ;;  %2221 = vmatprep.subr.bf16.mxu1 %v2412_v17 }
 0x1bf   :  { %2110 = vmatmul.mubr.msk.f32.vlgmr.msra.gmra.mrb[6].mxu0 %vm88_vm0, %v1044_v13  ;;  %2121 = vmatmul.mubr.msk.f32.vlgmr.msra.gmra.mrb[6].mxu1 %vm88_vm0, %v1044_v13 }
 0x1c0   :  { %2217 = vmatpush3.bf16.msra.mxu0 %v2535_v52  ;;  %2223 = vmatpush3.bf16.msra.mxu1 %v2537_v53 }
 0x1c1   :  { %2218 = vmatprep.subr.bf16.mxu0 %v2412_v17  ;;  %2224 = vmatprep.subr.bf16.mxu1 %v2412_v17 }
 0x1c2   :  { %2131 = vmatprep.mubr.msk.f32.mxu0 %vm2413_vm1, %v2414_v25  ;;  %2142 = vmatprep.mubr.msk.f32.mxu1 %vm2413_vm1, %v2414_v25 }
 0x1c4   :  { %2220 = vmatpush3.bf16.msra.mxu0 %v2183_v60  ;;  %2226 = vmatpush3.bf16.msra.mxu1 %v2189_v61 }
 0x1c5   :  { %2227 = vmatprep.subr.bf16.mxu0 %v2412_v17  ;;  %2233 = vmatprep.subr.bf16.mxu1 %v2412_v17 }
 0x1c7   :  { %2132 = vmatmul.mubr.msk.f32.vlgmr.msra.gmra.mrb[8].mxu0 %vm88_vm0, %v1044_v13  ;;  %2143 = vmatmul.mubr.msk.f32.vlgmr.msra.gmra.mrb[8].mxu1 %vm88_vm0, %v1044_v13 }
 0x1c8   :  { %2229 = vmatpush3.bf16.msra.mxu0 %v2192_v2  ;;  %2235 = vmatpush3.bf16.msra.mxu1 %v2198_v3 }
 0x1c9   :  { %2230 = vmatprep.subr.bf16.mxu0 %v2412_v17  ;;  %2236 = vmatprep.subr.bf16.mxu1 %v2412_v17  ;;  %v2599_v17 = vld [vmem:[#allocation10 + $0x1] ss:$0 sm:$0xff] }
 0x1ca   :  { %2153 = vmatprep.mubr.msk.f32.mxu0 %vm2413_vm1, %v2414_v25  ;;  %2164 = vmatprep.mubr.msk.f32.mxu1 %vm2413_vm1, %v2414_v25 }
 0x1cc   :  { %2232 = vmatpush3.bf16.msra.mxu0 %v2195_v8  ;;  %2238 = vmatpush3.bf16.msra.mxu1 %v2201_v9  ;;  %v2645_v8 = vld [vmem:[#allocation10 + $0x4] ss:$0 sm:$0xff] }
 0x1cf   :  { %2154 = vmatmul.mubr.msk.f32.vlgmr.msra.gmra.mrb[10].mxu0 %vm88_vm0, %v1044_v13  ;;  %2165 = vmatmul.mubr.msk.f32.vlgmr.msra.gmra.mrb[10].mxu1 %vm88_vm0, %v1044_v13  ;;  %v2650_v13 = vld [vmem:[#allocation10 + $0x5] ss:$0 sm:$0xff] }
 0x27a   :  { %v202_v22 = vpop.f32.mrb[0].mxu0  ;;  %v352_v23 = vpop.f32.mrb[0].mxu1 }
 0x27b   :  { %v203_v24 = vadd.f32 %v2597_v20, %v202_v22  ;;  %v353_v25 = vadd.f32 %v2599_v17, %v352_v23  ;;  %v2045_v26 = vpop.f32.mrb[1].mxu0  ;;  %v2056_v27 = vpop.f32.mrb[1].mxu1 }
 0x27d   :  { %v207_v28 = vcombine.high %v203_v24, %v203_v24  ;;  %v214_v29 = vrot.slane %v203_v24, %v2601_v21  ;;  %v357_v30 = vcombine.high %v353_v25, %v353_v25  ;;  %v364_v31 = vrot.slane %v353_v25, %v2601_v21 }
 0x27f   :  { %v221_v32 = vrot.slane %v207_v28, %v2601_v21  ;;  %v222_v33 = vcombine.high %v214_v29, %v214_v29  ;;  %v230_v34 = vrot.slane %v214_v29, %v2601_v21  ;;  %v371_v35 = vrot.slane %v357_v30, %v2601_v21 }
 0x280   :  { %v372_v36 = vcombine.high %v364_v31, %v364_v31  ;;  %v380_v37 = vrot.slane %v364_v31, %v2601_v21 }
 0x281   :  { %v223_v39 = vcombine.high %v221_v32, %v221_v32  ;;  %v237_v40 = vrot.slane %v221_v32, %v2601_v21  ;;  %v244_v41 = vrot.slane %v222_v33, %v2601_v21  ;;  %v252_v42 = vcombine.high %v230_v34, %v230_v34  ;;  %265 = vst.msk [vmem:[#allocation11] sm:$0x1] %vm264_vm2, %v230_v34 }
 0x282   :  { %v373_v44 = vcombine.high %v371_v35, %v371_v35  ;;  %v387_v45 = vrot.slane %v371_v35, %v2601_v21  ;;  %v394_v46 = vrot.slane %v372_v36, %v2601_v21  ;;  %v402_v47 = vcombine.high %v380_v37, %v380_v37  ;;  %415 = vst.msk [vmem:[#allocation11 + $0x10] sm:$0x1] %vm264_vm2, %v380_v37  ;;  %v502_v48 = vpop.f32.mrb[2].mxu0  ;;  %v652_v49 = vpop.f32.mrb[2].mxu1 }
 0x283   :  { %v251_v50 = vrot.slane %v223_v39, %v2601_v21  ;;  %v253_v51 = vcombine.high %v237_v40, %v237_v40  ;;  %v254_v52 = vcombine.high %v244_v41, %v244_v41  ;;  %266 = vst.msk [vmem:[#allocation11 + $0x2] sm:$0x1] %vm264_vm2, %v244_v41  ;;  %267 = vst.msk [vmem:[#allocation11 + $0x4] sm:$0x1] %vm264_vm2, %v252_v42  ;;  %v2067_v54 = vpop.f32.mrb[3].mxu0  ;;  %v2078_v55 = vpop.f32.mrb[3].mxu1 }
 0x284   :  { %269 = vst.msk [vmem:[#allocation11 + $0x8] sm:$0x1] %vm264_vm2, %v237_v40  ;;  %v503_v53 = vadd.f32 %v2611_v38, %v502_v48  ;;  %v401_v56 = vrot.slane %v373_v44, %v2601_v21  ;;  %v403_v57 = vcombine.high %v387_v45, %v387_v45  ;;  %v404_v58 = vcombine.high %v394_v46, %v394_v46 }
 0x285   :  { %416 = vst.msk [vmem:[#allocation11 + $0x12] sm:$0x1] %vm264_vm2, %v394_v46  ;;  %417 = vst.msk [vmem:[#allocation11 + $0x14] sm:$0x1] %vm264_vm2, %v402_v47  ;;  %v653_v59 = vadd.f32 %v2616_v43, %v652_v49  ;;  %v255_v60 = vcombine.high %v251_v50, %v251_v50 }
 0x286   :  { %419 = vst.msk [vmem:[#allocation11 + $0x18] sm:$0x1] %vm264_vm2, %v387_v45  ;;  %268 = vst.msk [vmem:[#allocation11 + $0x6] sm:$0x1] %vm264_vm2, %v254_v52  ;;  %v507_v61 = vcombine.high %v503_v53, %v503_v53  ;;  %v514_v62 = vrot.slane %v503_v53, %v2601_v21  ;;  %v405_v63 = vcombine.high %v401_v56, %v401_v56 }
 0x287   :  { %270 = vst.msk [vmem:[#allocation11 + $0xa] sm:$0x1] %vm264_vm2, %v251_v50  ;;  %271 = vst.msk [vmem:[#allocation11 + $0xc] sm:$0x1] %vm264_vm2, %v253_v51  ;;  %v657_v0 = vcombine.high %v653_v59, %v653_v59  ;;  %v664_v1 = vrot.slane %v653_v59, %v2601_v21 }
 0x288   :  { %418 = vst.msk [vmem:[#allocation11 + $0x16] sm:$0x1] %vm264_vm2, %v404_v58  ;;  %420 = vst.msk [vmem:[#allocation11 + $0x1a] sm:$0x1] %vm264_vm2, %v401_v56  ;;  %v521_v2 = vrot.slane %v507_v61, %v2601_v21  ;;  %v522_v3 = vcombine.high %v514_v62, %v514_v62  ;;  %v530_v4 = vrot.slane %v514_v62, %v2601_v21 }
 0x289   :  { %421 = vst.msk [vmem:[#allocation11 + $0x1c] sm:$0x1] %vm264_vm2, %v403_v57  ;;  %272 = vst.msk [vmem:[#allocation11 + $0xe] sm:$0x1] %vm264_vm2, %v255_v60  ;;  %v671_v5 = vrot.slane %v657_v0, %v2601_v21  ;;  %v672_v6 = vcombine.high %v664_v1, %v664_v1  ;;  %v680_v7 = vrot.slane %v664_v1, %v2601_v21 }
 0x28a   :  { %422 = vst.msk [vmem:[#allocation11 + $0x1e] sm:$0x1] %vm264_vm2, %v405_v63  ;;  %v523_v9 = vcombine.high %v521_v2, %v521_v2  ;;  %v537_v10 = vrot.slane %v521_v2, %v2601_v21  ;;  %v544_v11 = vrot.slane %v522_v3, %v2601_v21  ;;  %v552_v12 = vcombine.high %v530_v4, %v530_v4  ;;  %v802_v19 = vpop.f32.mrb[4].mxu0  ;;  %v952_v22 = vpop.f32.mrb[4].mxu1 }
 0x28b   :  { %565 = vst.msk [vmem:[#allocation11 + $0x20] sm:$0x1] %vm264_vm2, %v530_v4  ;;  %v673_v14 = vcombine.high %v671_v5, %v671_v5  ;;  %v687_v15 = vrot.slane %v671_v5, %v2601_v21  ;;  %v694_v16 = vrot.slane %v672_v6, %v2601_v21  ;;  %v702_v18 = vcombine.high %v680_v7, %v680_v7  ;;  %v2089_v27 = vpop.f32.mrb[5].mxu0  ;;  %v2100_v28 = vpop.f32.mrb[5].mxu1 }
 0x28c   :  { %715 = vst.msk [vmem:[#allocation11 + $0x30] sm:$0x1] %vm264_vm2, %v680_v7  ;;  %v551_v23 = vrot.slane %v523_v9, %v2601_v21  ;;  %v553_v24 = vcombine.high %v537_v10, %v537_v10  ;;  %v554_v25 = vcombine.high %v544_v11, %v544_v11  ;;  %566 = vst.msk [vmem:[#allocation11 + $0x22] sm:$0x1] %vm264_vm2, %v544_v11 }
 0x28d   :  { %567 = vst.msk [vmem:[#allocation11 + $0x24] sm:$0x1] %vm264_vm2, %v552_v12  ;;  %569 = vst.msk [vmem:[#allocation11 + $0x28] sm:$0x1] %vm264_vm2, %v537_v10  ;;  %v803_v26 = vadd.f32 %v2645_v8, %v802_v19  ;;  %v701_v29 = vrot.slane %v673_v14, %v2601_v21  ;;  %v703_v30 = vcombine.high %v687_v15, %v687_v15 }
 0x28e   :  { %v704_v31 = vcombine.high %v694_v16, %v694_v16  ;;  %716 = vst.msk [vmem:[#allocation11 + $0x32] sm:$0x1] %vm264_vm2, %v694_v16  ;;  %717 = vst.msk [vmem:[#allocation11 + $0x34] sm:$0x1] %vm264_vm2, %v702_v18  ;;  %v953_v32 = vadd.f32 %v2650_v13, %v952_v22  ;;  %v555_v33 = vcombine.high %v551_v23, %v551_v23 }
 0x28f   :  { %719 = vst.msk [vmem:[#allocation11 + $0x38] sm:$0x1] %vm264_vm2, %v687_v15  ;;  %568 = vst.msk [vmem:[#allocation11 + $0x26] sm:$0x1] %vm264_vm2, %v554_v25  ;;  %v807_v34 = vcombine.high %v803_v26, %v803_v26  ;;  %v814_v35 = vrot.slane %v803_v26, %v2601_v21  ;;  %v705_v36 = vcombine.high %v701_v29, %v701_v29 }
 0x290   :  { %570 = vst.msk [vmem:[#allocation11 + $0x2a] sm:$0x1] %vm264_vm2, %v551_v23  ;;  %571 = vst.msk [vmem:[#allocation11 + $0x2c] sm:$0x1] %vm264_vm2, %v553_v24  ;;  %v957_v37 = vcombine.high %v953_v32, %v953_v32  ;;  %v964_v39 = vrot.slane %v953_v32, %v2601_v21 }
 0x291   :  { %718 = vst.msk [vmem:[#allocation11 + $0x36] sm:$0x1] %vm264_vm2, %v704_v31  ;;  %720 = vst.msk [vmem:[#allocation11 + $0x3a] sm:$0x1] %vm264_vm2, %v701_v29  ;;  %v821_v40 = vrot.slane %v807_v34, %v2601_v21  ;;  %v822_v41 = vcombine.high %v814_v35, %v814_v35  ;;  %v830_v42 = vrot.slane %v814_v35, %v2601_v21 }
 0x292   :  { %721 = vst.msk [vmem:[#allocation11 + $0x3c] sm:$0x1] %vm264_vm2, %v703_v30  ;;  %572 = vst.msk [vmem:[#allocation11 + $0x2e] sm:$0x1] %vm264_vm2, %v555_v33  ;;  %v971_v44 = vrot.slane %v957_v37, %v2601_v21  ;;  %v972_v45 = vcombine.high %v964_v39, %v964_v39  ;;  %v980_v46 = vrot.slane %v964_v39, %v2601_v21  ;;  %v1125_v55 = vpop.f32.mrb[6].mxu0  ;;  %v1272_v56 = vpop.f32.mrb[6].mxu1 }
 0x293   :  { %722 = vst.msk [vmem:[#allocation11 + $0x3e] sm:$0x1] %vm264_vm2, %v705_v36  ;;  %v823_v47 = vcombine.high %v821_v40, %v821_v40  ;;  %v837_v48 = vrot.slane %v821_v40, %v2601_v21  ;;  %v844_v49 = vrot.slane %v822_v41, %v2601_v21  ;;  %v852_v50 = vcombine.high %v830_v42, %v830_v42  ;;  %v2111_v61 = vpop.f32.mrb[7].mxu0  ;;  %v2122_v62 = vpop.f32.mrb[7].mxu1 }
 0x294   :  { %865 = vst.msk [vmem:[#allocation11 + $0x40] sm:$0x1] %vm264_vm2, %v830_v42  ;;  %v973_v51 = vcombine.high %v971_v44, %v971_v44  ;;  %v987_v52 = vrot.slane %v971_v44, %v2601_v21  ;;  %v994_v53 = vrot.slane %v972_v45, %v2601_v21  ;;  %v1002_v54 = vcombine.high %v980_v46, %v980_v46 }
 0x295   :  { %1015 = vst.msk [vmem:[#allocation11 + $0x50] sm:$0x1] %vm264_vm2, %v980_v46  ;;  %v851_v57 = vrot.slane %v823_v47, %v2601_v21  ;;  %v853_v58 = vcombine.high %v837_v48, %v837_v48  ;;  %v854_v59 = vcombine.high %v844_v49, %v844_v49  ;;  %866 = vst.msk [vmem:[#allocation11 + $0x42] sm:$0x1] %vm264_vm2, %v844_v49 }
 0x296   :  { %867 = vst.msk [vmem:[#allocation11 + $0x44] sm:$0x1] %vm264_vm2, %v852_v50  ;;  %869 = vst.msk [vmem:[#allocation11 + $0x48] sm:$0x1] %vm264_vm2, %v837_v48  ;;  %v1126_v60 = vadd.f32 %v2597_v20, %v1125_v55  ;;  %v1001_v63 = vrot.slane %v973_v51, %v2601_v21  ;;  %v1003_v0 = vcombine.high %v987_v52, %v987_v52 }
 0x297   :  { %v1004_v1 = vcombine.high %v994_v53, %v994_v53  ;;  %1016 = vst.msk [vmem:[#allocation11 + $0x52] sm:$0x1] %vm264_vm2, %v994_v53  ;;  %1017 = vst.msk [vmem:[#allocation11 + $0x54] sm:$0x1] %vm264_vm2, %v1002_v54  ;;  %v1273_v2 = vadd.f32 %v2599_v17, %v1272_v56  ;;  %v855_v3 = vcombine.high %v851_v57, %v851_v57 }
 0x298   :  { %1019 = vst.msk [vmem:[#allocation11 + $0x58] sm:$0x1] %vm264_vm2, %v987_v52  ;;  %868 = vst.msk [vmem:[#allocation11 + $0x46] sm:$0x1] %vm264_vm2, %v854_v59  ;;  %v1130_v20 = vcombine.high %v1126_v60, %v1126_v60  ;;  %v1137_v4 = vrot.slane %v1126_v60, %v2601_v21  ;;  %v1005_v5 = vcombine.high %v1001_v63, %v1001_v63 }
 0x299   :  { %870 = vst.msk [vmem:[#allocation11 + $0x4a] sm:$0x1] %vm264_vm2, %v851_v57  ;;  %871 = vst.msk [vmem:[#allocation11 + $0x4c] sm:$0x1] %vm264_vm2, %v853_v58  ;;  %v1277_v6 = vcombine.high %v1273_v2, %v1273_v2  ;;  %v1284_v17 = vrot.slane %v1273_v2, %v2601_v21 }
 0x29a   :  { %1018 = vst.msk [vmem:[#allocation11 + $0x56] sm:$0x1] %vm264_vm2, %v1004_v1  ;;  %1020 = vst.msk [vmem:[#allocation11 + $0x5a] sm:$0x1] %vm264_vm2, %v1001_v63  ;;  %v1144_v7 = vrot.slane %v1130_v20, %v2601_v21  ;;  %v1145_v9 = vcombine.high %v1137_v4, %v1137_v4  ;;  %v1153_v10 = vrot.slane %v1137_v4, %v2601_v21  ;;  %v1419_v26 = vpop.f32.mrb[8].mxu0  ;;  %v1566_v27 = vpop.f32.mrb[8].mxu1 }
 0x29b   :  { %1021 = vst.msk [vmem:[#allocation11 + $0x5c] sm:$0x1] %vm264_vm2, %v1003_v0  ;;  %872 = vst.msk [vmem:[#allocation11 + $0x4e] sm:$0x1] %vm264_vm2, %v855_v3  ;;  %v1291_v11 = vrot.slane %v1277_v6, %v2601_v21  ;;  %v1292_v12 = vcombine.high %v1284_v17, %v1284_v17  ;;  %v1300_v14 = vrot.slane %v1284_v17, %v2601_v21  ;;  %v2133_v32 = vpop.f32.mrb[9].mxu0  ;;  %v2144_v33 = vpop.f32.mrb[9].mxu1 }
 0x29c   :  { %1022 = vst.msk [vmem:[#allocation11 + $0x5e] sm:$0x1] %vm264_vm2, %v1005_v5  ;;  %v1146_v15 = vcombine.high %v1144_v7, %v1144_v7  ;;  %v1160_v16 = vrot.slane %v1144_v7, %v2601_v21  ;;  %v1167_v18 = vrot.slane %v1145_v9, %v2601_v21  ;;  %v1175_v19 = vcombine.high %v1153_v10, %v1153_v10 }
 0x29d   :  { %1187 = vst.msk [vmem:[#allocation11 + $0x1] sm:$0x1] %vm264_vm2, %v1153_v10  ;;  %v1293_v22 = vcombine.high %v1291_v11, %v1291_v11  ;;  %v1307_v23 = vrot.slane %v1291_v11, %v2601_v21  ;;  %v1314_v24 = vrot.slane %v1292_v12, %v2601_v21  ;;  %v1322_v25 = vcombine.high %v1300_v14, %v1300_v14 }
 0x29e   :  { %1334 = vst.msk [vmem:[#allocation11 + $0x11] sm:$0x1] %vm264_vm2, %v1300_v14  ;;  %v1174_v28 = vrot.slane %v1146_v15, %v2601_v21  ;;  %v1176_v29 = vcombine.high %v1160_v16, %v1160_v16  ;;  %v1177_v30 = vcombine.high %v1167_v18, %v1167_v18  ;;  %1188 = vst.msk [vmem:[#allocation11 + $0x3] sm:$0x1] %vm264_vm2, %v1167_v18 }
 0x29f   :  { %1189 = vst.msk [vmem:[#allocation11 + $0x5] sm:$0x1] %vm264_vm2, %v1175_v19  ;;  %1191 = vst.msk [vmem:[#allocation11 + $0x9] sm:$0x1] %vm264_vm2, %v1160_v16  ;;  %v1420_v31 = vadd.f32 %v2611_v38, %v1419_v26  ;;  %v1321_v34 = vrot.slane %v1293_v22, %v2601_v21  ;;  %v1323_v35 = vcombine.high %v1307_v23, %v1307_v23 }
 0x2a0   :  { %v1324_v36 = vcombine.high %v1314_v24, %v1314_v24  ;;  %1335 = vst.msk [vmem:[#allocation11 + $0x13] sm:$0x1] %vm264_vm2, %v1314_v24  ;;  %1336 = vst.msk [vmem:[#allocation11 + $0x15] sm:$0x1] %vm264_vm2, %v1322_v25  ;;  %v1567_v37 = vadd.f32 %v2616_v43, %v1566_v27  ;;  %v1178_v39 = vcombine.high %v1174_v28, %v1174_v28 }
 0x2a1   :  { %1338 = vst.msk [vmem:[#allocation11 + $0x19] sm:$0x1] %vm264_vm2, %v1307_v23  ;;  %1190 = vst.msk [vmem:[#allocation11 + $0x7] sm:$0x1] %vm264_vm2, %v1177_v30  ;;  %v1424_v38 = vcombine.high %v1420_v31, %v1420_v31  ;;  %v1431_v40 = vrot.slane %v1420_v31, %v2601_v21  ;;  %v1325_v41 = vcombine.high %v1321_v34, %v1321_v34 }
 0x2a2   :  { %1192 = vst.msk [vmem:[#allocation11 + $0xb] sm:$0x1] %vm264_vm2, %v1174_v28  ;;  %1193 = vst.msk [vmem:[#allocation11 + $0xd] sm:$0x1] %vm264_vm2, %v1176_v29  ;;  %v1571_v42 = vcombine.high %v1567_v37, %v1567_v37  ;;  %v1578_v43 = vrot.slane %v1567_v37, %v2601_v21  ;;  %v1713_v58 = vpop.f32.mrb[10].mxu0  ;;  %v1860_v59 = vpop.f32.mrb[10].mxu1 }
 0x2a3   :  { %1337 = vst.msk [vmem:[#allocation11 + $0x17] sm:$0x1] %vm264_vm2, %v1324_v36  ;;  %1339 = vst.msk [vmem:[#allocation11 + $0x1b] sm:$0x1] %vm264_vm2, %v1321_v34  ;;  %v1438_v44 = vrot.slane %v1424_v38, %v2601_v21  ;;  %v1439_v45 = vcombine.high %v1431_v40, %v1431_v40  ;;  %v1447_v46 = vrot.slane %v1431_v40, %v2601_v21  ;;  %v2155_v0 = vpop.f32.mrb[11].mxu0  ;;  %v2166_v1 = vpop.f32.mrb[11].mxu1 }
 0x2a4   :  { %1340 = vst.msk [vmem:[#allocation11 + $0x1d] sm:$0x1] %vm264_vm2, %v1323_v35  ;;  %1194 = vst.msk [vmem:[#allocation11 + $0xf] sm:$0x1] %vm264_vm2, %v1178_v39  ;;  %v1585_v47 = vrot.slane %v1571_v42, %v2601_v21  ;;  %v1586_v48 = vcombine.high %v1578_v43, %v1578_v43  ;;  %v1594_v49 = vrot.slane %v1578_v43, %v2601_v21 }
 0x2a5   :  { %1341 = vst.msk [vmem:[#allocation11 + $0x1f] sm:$0x1] %vm264_vm2, %v1325_v41  ;;  %v1440_v50 = vcombine.high %v1438_v44, %v1438_v44  ;;  %v1454_v51 = vrot.slane %v1438_v44, %v2601_v21  ;;  %v1461_v52 = vrot.slane %v1439_v45, %v2601_v21  ;;  %v1469_v53 = vcombine.high %v1447_v46, %v1447_v46 }
 0x2a6   :  { %1481 = vst.msk [vmem:[#allocation11 + $0x21] sm:$0x1] %vm264_vm2, %v1447_v46  ;;  %v1587_v54 = vcombine.high %v1585_v47, %v1585_v47  ;;  %v1601_v55 = vrot.slane %v1585_v47, %v2601_v21  ;;  %v1608_v56 = vrot.slane %v1586_v48, %v2601_v21  ;;  %v1616_v57 = vcombine.high %v1594_v49, %v1594_v49 }
 0x2a7   :  { %1628 = vst.msk [vmem:[#allocation11 + $0x31] sm:$0x1] %vm264_vm2, %v1594_v49  ;;  %v1468_v60 = vrot.slane %v1440_v50, %v2601_v21  ;;  %v1470_v61 = vcombine.high %v1454_v51, %v1454_v51  ;;  %v1471_v62 = vcombine.high %v1461_v52, %v1461_v52  ;;  %1482 = vst.msk [vmem:[#allocation11 + $0x23] sm:$0x1] %vm264_vm2, %v1461_v52 }
 0x2a8   :  { %1483 = vst.msk [vmem:[#allocation11 + $0x25] sm:$0x1] %vm264_vm2, %v1469_v53  ;;  %1485 = vst.msk [vmem:[#allocation11 + $0x29] sm:$0x1] %vm264_vm2, %v1454_v51  ;;  %v1714_v63 = vadd.f32 %v2645_v8, %v1713_v58  ;;  %v1615_v2 = vrot.slane %v1587_v54, %v2601_v21  ;;  %v1617_v3 = vcombine.high %v1601_v55, %v1601_v55 }
 0x2a9   :  { %v1618_v20 = vcombine.high %v1608_v56, %v1608_v56  ;;  %1629 = vst.msk [vmem:[#allocation11 + $0x33] sm:$0x1] %vm264_vm2, %v1608_v56  ;;  %1630 = vst.msk [vmem:[#allocation11 + $0x35] sm:$0x1] %vm264_vm2, %v1616_v57  ;;  %v1861_v4 = vadd.f32 %v2650_v13, %v1860_v59  ;;  %v1472_v5 = vcombine.high %v1468_v60, %v1468_v60 }
 0x2aa   :  { %1632 = vst.msk [vmem:[#allocation11 + $0x39] sm:$0x1] %vm264_vm2, %v1601_v55  ;;  %1484 = vst.msk [vmem:[#allocation11 + $0x27] sm:$0x1] %vm264_vm2, %v1471_v62  ;;  %v1718_v8 = vcombine.high %v1714_v63, %v1714_v63  ;;  %v1725_v6 = vrot.slane %v1714_v63, %v2601_v21  ;;  %v1619_v17 = vcombine.high %v1615_v2, %v1615_v2 }
 0x2ab   :  { %1486 = vst.msk [vmem:[#allocation11 + $0x2b] sm:$0x1] %vm264_vm2, %v1468_v60  ;;  %1487 = vst.msk [vmem:[#allocation11 + $0x2d] sm:$0x1] %vm264_vm2, %v1470_v61  ;;  %v1865_v7 = vcombine.high %v1861_v4, %v1861_v4  ;;  %v1872_v13 = vrot.slane %v1861_v4, %v2601_v21 }
 0x2ac   :  { %1631 = vst.msk [vmem:[#allocation11 + $0x37] sm:$0x1] %vm264_vm2, %v1618_v20  ;;  %1633 = vst.msk [vmem:[#allocation11 + $0x3b] sm:$0x1] %vm264_vm2, %v1615_v2  ;;  %v1732_v9 = vrot.slane %v1718_v8, %v2601_v21  ;;  %v1733_v10 = vcombine.high %v1725_v6, %v1725_v6  ;;  %v1741_v11 = vrot.slane %v1725_v6, %v2601_v21 }
 0x2ad   :  { %1634 = vst.msk [vmem:[#allocation11 + $0x3d] sm:$0x1] %vm264_vm2, %v1617_v3  ;;  %1488 = vst.msk [vmem:[#allocation11 + $0x2f] sm:$0x1] %vm264_vm2, %v1472_v5  ;;  %v1879_v12 = vrot.slane %v1865_v7, %v2601_v21  ;;  %v1880_v14 = vcombine.high %v1872_v13, %v1872_v13  ;;  %v1888_v15 = vrot.slane %v1872_v13, %v2601_v21 }
 0x2ae   :  { %1635 = vst.msk [vmem:[#allocation11 + $0x3f] sm:$0x1] %vm264_vm2, %v1619_v17  ;;  %v1734_v16 = vcombine.high %v1732_v9, %v1732_v9  ;;  %v1748_v18 = vrot.slane %v1732_v9, %v2601_v21  ;;  %v1755_v19 = vrot.slane %v1733_v10, %v2601_v21  ;;  %v1763_v22 = vcombine.high %v1741_v11, %v1741_v11 }
 0x2af   :  { %1775 = vst.msk [vmem:[#allocation11 + $0x41] sm:$0x1] %vm264_vm2, %v1741_v11  ;;  %v1881_v23 = vcombine.high %v1879_v12, %v1879_v12  ;;  %v1895_v24 = vrot.slane %v1879_v12, %v2601_v21  ;;  %v1902_v25 = vrot.slane %v1880_v14, %v2601_v21  ;;  %v1910_v26 = vcombine.high %v1888_v15, %v1888_v15 }
 0x2b0   :  { %1922 = vst.msk [vmem:[#allocation11 + $0x51] sm:$0x1] %vm264_vm2, %v1888_v15  ;;  %v1762_v27 = vrot.slane %v1734_v16, %v2601_v21  ;;  %v1764_v28 = vcombine.high %v1748_v18, %v1748_v18  ;;  %v1765_v29 = vcombine.high %v1755_v19, %v1755_v19  ;;  %1776 = vst.msk [vmem:[#allocation11 + $0x43] sm:$0x1] %vm264_vm2, %v1755_v19 }
 0x2b1   :  { %1777 = vst.msk [vmem:[#allocation11 + $0x45] sm:$0x1] %vm264_vm2, %v1763_v22  ;;  %1779 = vst.msk [vmem:[#allocation11 + $0x49] sm:$0x1] %vm264_vm2, %v1748_v18  ;;  %v1909_v30 = vrot.slane %v1881_v23, %v2601_v21  ;;  %v1911_v31 = vcombine.high %v1895_v24, %v1895_v24  ;;  %v1912_v32 = vcombine.high %v1902_v25, %v1902_v25 }
 0x2b2   :  { %1923 = vst.msk [vmem:[#allocation11 + $0x53] sm:$0x1] %vm264_vm2, %v1902_v25  ;;  %1924 = vst.msk [vmem:[#allocation11 + $0x55] sm:$0x1] %vm264_vm2, %v1910_v26  ;;  %v1766_v33 = vcombine.high %v1762_v27, %v1762_v27 }
 0x2b3   :  { %1926 = vst.msk [vmem:[#allocation11 + $0x59] sm:$0x1] %vm264_vm2, %v1895_v24  ;;  %1778 = vst.msk [vmem:[#allocation11 + $0x47] sm:$0x1] %vm264_vm2, %v1765_v29  ;;  %v1913_v34 = vcombine.high %v1909_v30, %v1909_v30 }
 0x2b4   :  { %1780 = vst.msk [vmem:[#allocation11 + $0x4b] sm:$0x1] %vm264_vm2, %v1762_v27  ;;  %1781 = vst.msk [vmem:[#allocation11 + $0x4d] sm:$0x1] %vm264_vm2, %v1764_v28 }
 0x2b5   :  { %1925 = vst.msk [vmem:[#allocation11 + $0x57] sm:$0x1] %vm264_vm2, %v1912_v32  ;;  %1927 = vst.msk [vmem:[#allocation11 + $0x5b] sm:$0x1] %vm264_vm2, %v1909_v30 }
 0x2b6   :  { %1928 = vst.msk [vmem:[#allocation11 + $0x5d] sm:$0x1] %vm264_vm2, %v1911_v31  ;;  %1782 = vst.msk [vmem:[#allocation11 + $0x4f] sm:$0x1] %vm264_vm2, %v1766_v33 }
 0x2b7   :  { %1929 = vst.msk [vmem:[#allocation11 + $0x5f] sm:$0x1] %vm264_vm2, %v1913_v34 }
 0x2b8   :  { %2384 = shalt.err (!%p2381_p2)
}
 0x2b9   :  { %s2385_s7 = scalar_lea.hbm %s2808_s5, 1536 }
 0x2ba   :  { %p2386_p3 = scmp.ne.s32.totalorder %s2808_s5, %s2385_s7  ;;  %p2389_p4 = scmp.lt.u32.totalorder %s2385_s7, %s2808_s5 }
 0x2bc   :  { %p2391_p5 = pnand %p2389_p4, %p2386_p3 }
 0x2be   :  { %2394 = shalt.err (!%p2391_p5)
}
 0x2bf   :  { %s2417_s13 = smov 32   ;;  %s2418_s14 = smov 2  }
 0x2c0   :  { %1941 = dma.vmem_to_hbm [thread:$0]  %s1936_s3, 1536, %s2808_s5, [#allocation4], %s2417_s13, %s2417_s13, %s2418_s14  }
 0x2c1   :  { %2401 = dma.done.wait [#allocation4], 1536  }
 0x2c2   :  { %2402 = vsyncadd [#allocation4], 4294965760 }
 0x2c3   :  { %1945 = vsyncpa [#allocation3], 1 }
 0x2c4   :  { %1946 = vsyncpa [#allocation6], 1 }
 0x2c5   :  { %1947 = vsyncpa [#allocation9], 1 }
 0x2c6   :  { %1948 = vsyncpa [#allocation4], 1 }

</bundles_post_ra>
